<compile_context>
chip_gen: v6e
topology: v6e:2x2x1
jax: 0.10.0
libtpu: 0.0.40
codegen_flags: <defaults>
</compile_context>

<pallas_src>
import functools

import jax
import jax.numpy as jnp
from jax.experimental import pallas as pl
from jax.experimental.pallas import tpu as pltpu

K = 11                   # conv kernel size (strided stages and PA depthwise conv)
PAD = K // 2             # 5
STRIDE = 2
KH = (K + 1) // STRIDE   # 6 folded stage-2 taps (tap 11 is zero)
DW_K = 11
CP = 128                 # lane-padded channel width for all activations/outputs


def _round_up(x, m):
    return (x + m - 1) // m * m


# ----------------------------- fused kernel --------------------------------

def fused_stem_kernel(x4c_ref, x4h_ref, w1_ref, sh1_ref, w2_ref, sh2_ref,
                      w3_ref, b3_ref, wd_ref, bd_ref, g_ref, beta_ref,
                      o_ref, xs_ref, acc_ref, xr_ref, zs_ref,
                      *, tl, l1, l2, c_valid):
    """One (batch, L-tile) step of the whole ConvStem.

    Global-row conventions (j0 = tile start at final L/4 resolution):
      xs row r       <-> raw samples x[4*(j0+r)-48 : 4*(j0+r)-44]
      xr row r       <-> folded stage-1: lanes[0:64]  = y1[2*(j0+r)-21, :]
                                          lanes[64:]   = y1[2*(j0+r)-20, :]
      acc/zs row r   <-> sequence position t = j0 - 8 + r   (8-row halo)
      output row r   <-> final position t = j0 + r
    """
    j0 = pl.program_id(1) * tl
    r1 = tl + 24            # stage-1 rows computed (needs tl + 21)
    r2 = tl + 16            # stage-2 / z rows computed (+-8 halo for the DW conv)
    lanes = jax.lax.broadcasted_iota(jnp.int32, (1, CP), 1)

    # ---- gather the compact input window (tile + 32-row right halo) --------
    xs_ref[pl.ds(0, tl), :] = x4c_ref[0]
    xs_ref[pl.ds(tl, 32), :] = x4h_ref[0]

    # ---- stage 1: Conv1d(1->c1, k=11, s=2, p=5) + BN + ReLU (folded) -------
    acc_ref[...] = jnp.dot(xs_ref[pl.ds(0, r1), :].astype(jnp.bfloat16),
                           w1_ref[0], preferred_element_type=jnp.float32)
    for c in range(1, 4):
        acc_ref[...] += jnp.dot(xs_ref[pl.ds(c, r1), :].astype(jnp.bfloat16),
                                w1_ref[c], preferred_element_type=jnp.float32)
    y1 = jnp.maximum(acc_ref[...] + sh1_ref[...], 0.0)
    rows1 = jax.lax.broadcasted_iota(jnp.int32, (r1, 1), 0) + j0
    s0 = 2 * rows1 - 21
    s1 = 2 * rows1 - 20
    keep = (((s0 >= 0) & (s0 < l1)) & (lanes < 64)) | \
           (((s1 >= 0) & (s1 < l1)) & (lanes >= 64))
    xr_ref[...] = jnp.where(keep, y1, 0.0).astype(xr_ref.dtype)

    # ---- stage 2: Conv1d(c1->c2, k=11, s=2, p=5) + BN + ReLU ---------------
    acc_ref[pl.ds(0, r2), :] = jnp.dot(xr_ref[pl.ds(0, r2), :], w2_ref[0],
                                       preferred_element_type=jnp.float32)
    for m in range(1, KH):
        acc_ref[pl.ds(0, r2), :] += jnp.dot(xr_ref[pl.ds(m, r2), :], w2_ref[m],
                                            preferred_element_type=jnp.float32)
    y2 = jnp.maximum(acc_ref[pl.ds(0, r2), :] + sh2_ref[...], 0.0)

    # ---- head: 1x1 conv (+bias); rows outside [0, l2) zeroed (DW-conv pad) -
    zw = jnp.dot(y2.astype(jnp.bfloat16), w3_ref[...],
                 preferred_element_type=jnp.float32) + b3_ref[...]
    t = jax.lax.broadcasted_iota(jnp.int32, (r2, 1), 0) + (j0 - 8)
    zs_ref[...] = jnp.where((t >= 0) & (t < l2), zw, 0.0)

    # ---- PA: depthwise Conv1d(k=11, p=5, groups=C) -> sigmoid gate ----------
    pa = jnp.zeros((tl, CP), jnp.float32) + bd_ref[...]
    for k in range(DW_K):
        pa = pa + zs_ref[pl.ds(3 + k, tl), :] * wd_ref[pl.ds(k, 1), :]
    z = zs_ref[pl.ds(8, tl), :]
    xg = z * jax.nn.sigmoid(pa)

    # ---- LayerNorm over the c_valid real channels (padded lanes are zero) ---
    inv_c = 1.0 / c_valid
    mu = jnp.sum(xg, axis=-1, keepdims=True) * inv_c
    d = jnp.where(lanes < c_valid, xg - mu, 0.0)
    var = jnp.sum(d * d, axis=-1, keepdims=True) * inv_c
    xn = (xg - mu) * jax.lax.rsqrt(var + 1e-6)
    o_ref[0] = (xn * g_ref[...] + beta_ref[...]).astype(o_ref.dtype)


# ----------------------------- weight preparation ---------------------------

def _prep_params(p):
    """Fold eval-mode BN into the conv weights and pad everything to 128 lanes."""
    c1 = p["w1"].shape[0]
    c2 = p["w2"].shape[0]
    assert c1 <= 64 and c2 <= CP, (c1, c2)

    # stage 1 (Cin = 1 specialised): weights indexed by the 16-sample window
    # column cc = 4*c + q, sample x[4j - 48 + cc].
    scale1 = p["g1"] * jax.lax.rsqrt(p["rv1"] + 1e-5)
    shift1 = p["b1"] - p["rm1"] * scale1
    w1s = p["w1"][:, 0, :] * scale1[:, None]                        # (c1, 11)
    W1 = jnp.zeros((16, CP), jnp.float32)
    W1 = W1.at[1:12, 0:c1].set(w1s.T)                               # half 0: k = cc - 1
    W1 = W1.at[3:14, 64:64 + c1].set(w1s.T)                         # half 1: k = cc - 3
    W1f = W1.reshape(4, 4, CP).astype(jnp.bfloat16)
    sh1 = jnp.zeros((CP,), jnp.float32).at[0:c1].set(shift1).at[64:64 + c1].set(shift1)
    sh1 = sh1.reshape(1, CP)

    # stage 2: space-to-depth folded taps (pairs of odd/even k share a matmul).
    scale2 = p["g2"] * jax.lax.rsqrt(p["rv2"] + 1e-5)
    shift2 = p["b2"] - p["rm2"] * scale2
    wk2 = jnp.transpose(p["w2"], (2, 1, 0)) * scale2[None, None, :]  # (11, c1, c2)
    wk2 = jnp.pad(wk2, ((0, 2 * KH - K), (0, 64 - c1), (0, CP - c2)))
    W2f = wk2.reshape(KH, CP, CP).astype(jnp.bfloat16)
    sh2 = jnp.pad(shift2, (0, CP - c2)).reshape(1, CP).astype(jnp.float32)

    # head: 1x1 conv, depthwise gate, LayerNorm.
    w3p = jnp.pad(p["w3"][:, :, 0].T, ((0, CP - c2), (0, CP - c2))).astype(jnp.bfloat16)
    b3p = jnp.pad(p["b3"], (0, CP - c2)).reshape(1, CP).astype(jnp.float32)
    wdp = jnp.pad(p["wd"][:, 0, :].T, ((0, 16 - DW_K), (0, CP - c2))).astype(jnp.float32)
    bdp = jnp.pad(p["bd"], (0, CP - c2)).reshape(1, CP).astype(jnp.float32)
    gp = jnp.pad(p["ln_g"], (0, CP - c2)).reshape(1, CP).astype(jnp.float32)
    bp = jnp.pad(p["ln_b"], (0, CP - c2)).reshape(1, CP).astype(jnp.float32)
    return W1f, sh1, W2f, sh2, w3p, b3p, wdp, bdp, gp, bp, c2


# ----------------------------- forward --------------------------------------

def conv_stem_forward(x, p, patch_size=4, tl=512, out_dtype=jnp.float32,
                      crop_output=True):
    """x: (B, in_ch, L) as in PyTorch.

    Returns (out, L // patch_size).  With crop_output=True (default, matches
    the PyTorch module) out is (B, L_out, out_ch) where L_out = ceil(ceil(L/2)/2).
    With crop_output=False the lane-dense padded buffer
    (B, round_up(L_out, tl), 128) is returned (preferred for downstream TPU
    consumers: avoids an XLA re-copy of the whole output).
    """
    B, Cin, L = x.shape
    if Cin != 1:
        # TODO(synk): general in_ch > 1 stage-1 path (module default is in_ch=1).
        raise NotImplementedError("conv_stem_forward is specialised for in_ch=1")

    L1 = (L - 1) // 2 + 1            # stage-1 output length
    L2 = (L1 - 1) // 2 + 1           # stage-2 / final output length
    tl = max(32, min(_round_up(tl, 32), _round_up(L2, 32)))
    nl = -(-L2 // tl)
    T4 = nl * tl + 32                # compact-input rows (incl. right halo slack)

    # Compact space-to-depth input: x4[b, i, q] = x[b, 4*i + q - 48]
    # (48 leading zeros so every tile only needs a RIGHT halo; trailing zeros
    #  provide the conv right padding).  ~4 bytes/sample in HBM.
    x4 = jnp.pad(x[:, 0, :].astype(jnp.float32),
                 ((0, 0), (48, 4 * T4 - 48 - L))).reshape(B, T4, 4)

    (W1f, sh1, W2f, sh2, w3p, b3p, wdp, bdp, gp, bp, c2) = _prep_params(p)

    kernel = functools.partial(fused_stem_kernel, tl=tl, l1=L1, l2=L2, c_valid=c2)
    out = pl.pallas_call(
        kernel,
        out_shape=jax.ShapeDtypeStruct((B, nl * tl, CP), out_dtype),
        grid_spec=pltpu.PrefetchScalarGridSpec(
            num_scalar_prefetch=0,
            grid=(B, nl),
            in_specs=[
                # compact input tile and its 32-row right halo (same array twice)
                pl.BlockSpec((1, tl, 4), lambda b, l: (b, l, 0)),
                pl.BlockSpec((1, 32, 4), lambda b, l: (b, (l + 1) * (tl // 32), 0)),
                pl.BlockSpec((4, 4, CP), lambda b, l: (0, 0, 0)),      # W1f
                pl.BlockSpec((1, CP), lambda b, l: (0, 0)),            # sh1
                pl.BlockSpec((KH, CP, CP), lambda b, l: (0, 0, 0)),    # W2f
                pl.BlockSpec((1, CP), lambda b, l: (0, 0)),            # sh2
                pl.BlockSpec((CP, CP), lambda b, l: (0, 0)),           # w3
                pl.BlockSpec((1, CP), lambda b, l: (0, 0)),            # b3
                pl.BlockSpec((16, CP), lambda b, l: (0, 0)),           # wd
                pl.BlockSpec((1, CP), lambda b, l: (0, 0)),            # bd
                pl.BlockSpec((1, CP), lambda b, l: (0, 0)),            # ln gamma
                pl.BlockSpec((1, CP), lambda b, l: (0, 0)),            # ln beta
            ],
            out_specs=pl.BlockSpec((1, tl, CP), lambda b, l: (b, l, 0)),
            scratch_shapes=[
                pltpu.VMEM((tl + 32, 4), jnp.float32),    # input window
                pltpu.VMEM((tl + 24, CP), jnp.float32),   # f32 matmul accumulator
                pltpu.VMEM((tl + 24, CP), jnp.bfloat16),  # folded stage-1 activations
                pltpu.VMEM((tl + 16, CP), jnp.float32),   # z (1x1-conv output)
            ],
        ),
        compiler_params=pltpu.CompilerParams(
            dimension_semantics=("parallel", "parallel")),
    )(x4, x4, W1f, sh1, W2f, sh2, w3p, b3p, wdp, bdp, gp, bp)

    if crop_output:
        out = out[:, :L2, :c2]
    return out, L // patch_size


def init_params(key, in_ch=1, out_ch=96):
    c1 = out_ch // 2
    ks = jax.random.split(key, 16)
    n = lambda k, s: 0.1 * jax.random.normal(k, s, jnp.float32)
    return dict(
        w1=n(ks[0], (c1, in_ch, 11)),
        g1=1.0 + n(ks[1], (c1,)), b1=n(ks[2], (c1,)),
        rm1=n(ks[3], (c1,)), rv1=1.0 + 0.1 * jnp.abs(jax.random.normal(ks[4], (c1,))),
        w2=n(ks[5], (out_ch, c1, 11)),
        g2=1.0 + n(ks[6], (out_ch,)), b2=n(ks[7], (out_ch,)),
        rm2=n(ks[8], (out_ch,)), rv2=1.0 + 0.1 * jnp.abs(jax.random.normal(ks[9], (out_ch,))),
        w3=n(ks[10], (out_ch, out_ch, 1)), b3=n(ks[11], (out_ch,)),
        wd=n(ks[12], (out_ch, 1, 11)), bd=n(ks[13], (out_ch,)),
        ln_g=1.0 + n(ks[14], (out_ch,)), ln_b=n(ks[15], (out_ch,)),
    )


# ----------------------------- pure-JAX reference ---------------------------

def reference_forward(x, p, patch_size=4):
    def conv1d(x, w, stride, pad, groups=1):
        return jax.lax.conv_general_dilated(
            x, w, window_strides=(stride,), padding=[(pad, pad)],
            dimension_numbers=("NCH", "OIH", "NCH"), feature_group_count=groups)

    def bn(y, g, b, rm, rv):
        s = g / jnp.sqrt(rv + 1e-5)
        return y * s[None, :, None] + (b - rm * s)[None, :, None]

    B, _, L = x.shape
    y = jax.nn.relu(bn(conv1d(x, p["w1"], 2, 5), p["g1"], p["b1"], p["rm1"], p["rv1"]))
    y = jax.nn.relu(bn(conv1d(y, p["w2"], 2, 5), p["g2"], p["b2"], p["rm2"], p["rv2"]))
    z = conv1d(y, p["w3"], 1, 0) + p["b3"][None, :, None]
    pa = conv1d(z, p["wd"], 1, DW_K // 2, groups=z.shape[1]) + p["bd"][None, :, None]
    z = z * jax.nn.sigmoid(pa)
    z = jnp.transpose(z, (0, 2, 1))
    mu = jnp.mean(z, -1, keepdims=True)
    var = jnp.mean((z - mu) ** 2, -1, keepdims=True)
    z = (z - mu) / jnp.sqrt(var + 1e-6) * p["ln_g"] + p["ln_b"]
    return z, L // patch_size


if __name__ == "__main__":
    key = jax.random.PRNGKey(0)
    kx, kp = jax.random.split(key)
    params = init_params(kp, in_ch=1, out_ch=96)

    fwd = jax.jit(functools.partial(conv_stem_forward, patch_size=4))

    # Small, module-shaped case.
    B, L = 2, 64
    x = jax.random.normal(kx, (B, 1, L), jnp.float32)
    out, L_out = fwd(x, params)
    out = jax.block_until_ready(out)
    ref, L_ref = reference_forward(x, params)
    assert out.shape == (B, L // 4, 96), out.shape
    assert int(L_out) == int(L_ref) == L // 4
    err = float(jnp.max(jnp.abs(out - ref)))
    merr = float(jnp.mean(jnp.abs(out - ref)))
    # bf16 matmul operands + bf16 folded stage-1 activations give ~1% relative
    # error after LayerNorm; the mean-abs check guards against layout bugs.
    assert err < 1.5e-1, f"max abs err {err}"
    assert merr < 2e-2, f"mean abs err {merr}"

    # Longer, non-multiple-of-tile (and non-multiple-of-4) case: exercises
    # multi-tile halos, last-tile row masking and the bounded-VMEM path.
    B2, L2_in = 1, 4501
    x2 = jax.random.normal(jax.random.PRNGKey(1), (B2, 1, L2_in), jnp.float32)
    out2, _ = fwd(x2, params)
    out2 = jax.block_until_ready(out2)
    ref2, _ = reference_forward(x2, params)
    assert out2.shape == ref2.shape, (out2.shape, ref2.shape)
    err2 = float(jnp.max(jnp.abs(out2 - ref2)))
    merr2 = float(jnp.mean(jnp.abs(out2 - ref2)))
    assert err2 < 1.5e-1, f"max abs err {err2}"
    assert merr2 < 2e-2, f"mean abs err {merr2}"

    print("KERNEL_OK")
</pallas_src>

<mosaic_0001>
module attributes {stable_mosaic.version = 11 : i64} {
  func.func @fused_stem_kernel(%arg0: i32, %arg1: i32, %arg2: memref<1x32x4xf32, #tpu.memory_space<vmem>>, %arg3: memref<1x32x4xf32, #tpu.memory_space<vmem>>, %arg4: memref<4x4x128xbf16, #tpu.memory_space<vmem>>, %arg5: memref<1x128xf32, #tpu.memory_space<vmem>>, %arg6: memref<6x128x128xbf16, #tpu.memory_space<vmem>>, %arg7: memref<1x128xf32, #tpu.memory_space<vmem>>, %arg8: memref<128x128xbf16, #tpu.memory_space<vmem>>, %arg9: memref<1x128xf32, #tpu.memory_space<vmem>>, %arg10: memref<16x128xf32, #tpu.memory_space<vmem>>, %arg11: memref<1x128xf32, #tpu.memory_space<vmem>>, %arg12: memref<1x128xf32, #tpu.memory_space<vmem>>, %arg13: memref<1x128xf32, #tpu.memory_space<vmem>>, %arg14: memref<1x32x128xf32, #tpu.memory_space<vmem>>, %arg15: memref<64x4xf32, #tpu.memory_space<vmem>>, %arg16: memref<56x128xf32, #tpu.memory_space<vmem>>, %arg17: memref<56x128xbf16, #tpu.memory_space<vmem>>, %arg18: memref<48x128xf32, #tpu.memory_space<vmem>>) attributes {dimension_semantics = [#tpu.dimension_semantics<parallel>, #tpu.dimension_semantics<parallel>], iteration_bounds = array<i64: 2, 1>, scalar_prefetch = 0 : i64, scratch_operands = 4 : i64, tpu.core_type = #tpu.core_type<tc>, window_params = [{transform_indices = @transform_0, window_bounds = array<i64: 1, 32, 4>}, {transform_indices = @transform_1, window_bounds = array<i64: 1, 32, 4>}, {pipeline_mode = #tpu.pipeline_mode<synchronous>, transform_indices = @transform_2, window_bounds = array<i64: 4, 4, 128>}, {pipeline_mode = #tpu.pipeline_mode<synchronous>, transform_indices = @transform_3, window_bounds = array<i64: 1, 128>}, {pipeline_mode = #tpu.pipeline_mode<synchronous>, transform_indices = @transform_4, window_bounds = array<i64: 6, 128, 128>}, {pipeline_mode = #tpu.pipeline_mode<synchronous>, transform_indices = @transform_5, window_bounds = array<i64: 1, 128>}, {pipeline_mode = #tpu.pipeline_mode<synchronous>, transform_indices = @transform_6, window_bounds = array<i64: 128, 128>}, {pipeline_mode = #tpu.pipeline_mode<synchronous>, transform_indices = @transform_7, window_bounds = array<i64: 1, 128>}, {pipeline_mode = #tpu.pipeline_mode<synchronous>, transform_indices = @transform_8, window_bounds = array<i64: 16, 128>}, {pipeline_mode = #tpu.pipeline_mode<synchronous>, transform_indices = @transform_9, window_bounds = array<i64: 1, 128>}, {pipeline_mode = #tpu.pipeline_mode<synchronous>, transform_indices = @transform_10, window_bounds = array<i64: 1, 128>}, {pipeline_mode = #tpu.pipeline_mode<synchronous>, transform_indices = @transform_11, window_bounds = array<i64: 1, 128>}, {transform_indices = @transform_12, window_bounds = array<i64: 1, 32, 128>}]} {
    %c32_i32 = arith.constant 32 : i32
    %0 = arith.muli %arg1, %c32_i32 : i32
    %1 = tpu.iota {dimensions = array<i32: 1>} : vector<1x128xi32>
    %c0 = arith.constant 0 : index
    %c0_0 = arith.constant 0 : index
    %c0_1 = arith.constant 0 : index
    %2 = vector.load %arg2[%c0, %c0_0, %c0_1] : memref<1x32x4xf32, #tpu.memory_space<vmem>>, vector<1x32x4xf32>
    %3 = vector.shape_cast %2 : vector<1x32x4xf32> to vector<32x4xf32>
    %c0_2 = arith.constant 0 : index
    %c0_3 = arith.constant 0 : index
    %4 = vector.load %arg15[%c0_2, %c0_3] : memref<64x4xf32, #tpu.memory_space<vmem>>, vector<32x4xf32>
    tpu.vector_store %arg15[%c0_2, %c0_3], %3 {strides = array<i32>} : memref<64x4xf32, #tpu.memory_space<vmem>>, vector<32x4xf32>,
    %c0_4 = arith.constant 0 : index
    %c0_5 = arith.constant 0 : index
    %c0_6 = arith.constant 0 : index
    %5 = vector.load %arg3[%c0_4, %c0_5, %c0_6] : memref<1x32x4xf32, #tpu.memory_space<vmem>>, vector<1x32x4xf32>
    %6 = vector.shape_cast %5 : vector<1x32x4xf32> to vector<32x4xf32>
    %c32 = arith.constant 32 : index
    %c0_7 = arith.constant 0 : index
    %7 = vector.load %arg15[%c32, %c0_7] : memref<64x4xf32, #tpu.memory_space<vmem>>, vector<32x4xf32>
    tpu.vector_store %arg15[%c32, %c0_7], %6 {strides = array<i32>} : memref<64x4xf32, #tpu.memory_space<vmem>>, vector<32x4xf32>,
    %c0_8 = arith.constant 0 : index
    %c0_9 = arith.constant 0 : index
    %8 = vector.load %arg15[%c0_8, %c0_9] : memref<64x4xf32, #tpu.memory_space<vmem>>, vector<56x4xf32>
    %9 = arith.truncf %8 : vector<56x4xf32> to vector<56x4xbf16>
    %c0_10 = arith.constant 0 : index
    %c0_11 = arith.constant 0 : index
    %c0_12 = arith.constant 0 : index
    %10 = vector.load %arg4[%c0_10, %c0_11, %c0_12] : memref<4x4x128xbf16, #tpu.memory_space<vmem>>, vector<1x4x128xbf16>
    %11 = vector.shape_cast %10 : vector<1x4x128xbf16> to vector<4x128xbf16>
    %cst = arith.constant dense<0.000000e+00> : vector<56x128xf32>
    %12 = tpu.matmul %9, %11, %cst {dimension_numbers = #tpu.dot_dimension_numbers<[1], [0], [0], [1], [0, 0, 1, 1], [], []>} : vector<56x4xbf16>, vector<4x128xbf16>, vector<56x128xf32> -> vector<56x128xf32>
    %c0_13 = arith.constant 0 : index
    %c0_14 = arith.constant 0 : index
    %13 = vector.load %arg16[%c0_13, %c0_14] : memref<56x128xf32, #tpu.memory_space<vmem>>, vector<56x128xf32>
    tpu.vector_store %arg16[%c0_13, %c0_14], %12 {strides = array<i32>} : memref<56x128xf32, #tpu.memory_space<vmem>>, vector<56x128xf32>,
    %c0_15 = arith.constant 0 : index
    %c0_16 = arith.constant 0 : index
    %14 = vector.load %arg16[%c0_15, %c0_16] : memref<56x128xf32, #tpu.memory_space<vmem>>, vector<56x128xf32>
    %c1 = arith.constant 1 : index
    %c0_17 = arith.constant 0 : index
    %15 = vector.load %arg15[%c1, %c0_17] : memref<64x4xf32, #tpu.memory_space<vmem>>, vector<56x4xf32>
    %16 = arith.truncf %15 : vector<56x4xf32> to vector<56x4xbf16>
    %c1_18 = arith.constant 1 : index
    %c0_19 = arith.constant 0 : index
    %c0_20 = arith.constant 0 : index
    %17 = vector.load %arg4[%c1_18, %c0_19, %c0_20] : memref<4x4x128xbf16, #tpu.memory_space<vmem>>, vector<1x4x128xbf16>
    %18 = vector.shape_cast %17 : vector<1x4x128xbf16> to vector<4x128xbf16>
    %cst_21 = arith.constant dense<0.000000e+00> : vector<56x128xf32>
    %19 = tpu.matmul %16, %18, %cst_21 {dimension_numbers = #tpu.dot_dimension_numbers<[1], [0], [0], [1], [0, 0, 1, 1], [], []>} : vector<56x4xbf16>, vector<4x128xbf16>, vector<56x128xf32> -> vector<56x128xf32>
    %20 = arith.addf %14, %19 : vector<56x128xf32>
    %c0_22 = arith.constant 0 : index
    %c0_23 = arith.constant 0 : index
    %21 = vector.load %arg16[%c0_22, %c0_23] : memref<56x128xf32, #tpu.memory_space<vmem>>, vector<56x128xf32>
    tpu.vector_store %arg16[%c0_22, %c0_23], %20 {strides = array<i32>} : memref<56x128xf32, #tpu.memory_space<vmem>>, vector<56x128xf32>,
    %c0_24 = arith.constant 0 : index
    %c0_25 = arith.constant 0 : index
    %22 = vector.load %arg16[%c0_24, %c0_25] : memref<56x128xf32, #tpu.memory_space<vmem>>, vector<56x128xf32>
    %c2 = arith.constant 2 : index
    %c0_26 = arith.constant 0 : index
    %23 = vector.load %arg15[%c2, %c0_26] : memref<64x4xf32, #tpu.memory_space<vmem>>, vector<56x4xf32>
    %24 = arith.truncf %23 : vector<56x4xf32> to vector<56x4xbf16>
    %c2_27 = arith.constant 2 : index
    %c0_28 = arith.constant 0 : index
    %c0_29 = arith.constant 0 : index
    %25 = vector.load %arg4[%c2_27, %c0_28, %c0_29] : memref<4x4x128xbf16, #tpu.memory_space<vmem>>, vector<1x4x128xbf16>
    %26 = vector.shape_cast %25 : vector<1x4x128xbf16> to vector<4x128xbf16>
    %cst_30 = arith.constant dense<0.000000e+00> : vector<56x128xf32>
    %27 = tpu.matmul %24, %26, %cst_30 {dimension_numbers = #tpu.dot_dimension_numbers<[1], [0], [0], [1], [0, 0, 1, 1], [], []>} : vector<56x4xbf16>, vector<4x128xbf16>, vector<56x128xf32> -> vector<56x128xf32>
    %28 = arith.addf %22, %27 : vector<56x128xf32>
    %c0_31 = arith.constant 0 : index
    %c0_32 = arith.constant 0 : index
    %29 = vector.load %arg16[%c0_31, %c0_32] : memref<56x128xf32, #tpu.memory_space<vmem>>, vector<56x128xf32>
    tpu.vector_store %arg16[%c0_31, %c0_32], %28 {strides = array<i32>} : memref<56x128xf32, #tpu.memory_space<vmem>>, vector<56x128xf32>,
    %c0_33 = arith.constant 0 : index
    %c0_34 = arith.constant 0 : index
    %30 = vector.load %arg16[%c0_33, %c0_34] : memref<56x128xf32, #tpu.memory_space<vmem>>, vector<56x128xf32>
    %c3 = arith.constant 3 : index
    %c0_35 = arith.constant 0 : index
    %31 = vector.load %arg15[%c3, %c0_35] : memref<64x4xf32, #tpu.memory_space<vmem>>, vector<56x4xf32>
    %32 = arith.truncf %31 : vector<56x4xf32> to vector<56x4xbf16>
    %c3_36 = arith.constant 3 : index
    %c0_37 = arith.constant 0 : index
    %c0_38 = arith.constant 0 : index
    %33 = vector.load %arg4[%c3_36, %c0_37, %c0_38] : memref<4x4x128xbf16, #tpu.memory_space<vmem>>, vector<1x4x128xbf16>
    %34 = vector.shape_cast %33 : vector<1x4x128xbf16> to vector<4x128xbf16>
    %cst_39 = arith.constant dense<0.000000e+00> : vector<56x128xf32>
    %35 = tpu.matmul %32, %34, %cst_39 {dimension_numbers = #tpu.dot_dimension_numbers<[1], [0], [0], [1], [0, 0, 1, 1], [], []>} : vector<56x4xbf16>, vector<4x128xbf16>, vector<56x128xf32> -> vector<56x128xf32>
    %36 = arith.addf %30, %35 : vector<56x128xf32>
    %c0_40 = arith.constant 0 : index
    %c0_41 = arith.constant 0 : index
    %37 = vector.load %arg16[%c0_40, %c0_41] : memref<56x128xf32, #tpu.memory_space<vmem>>, vector<56x128xf32>
    tpu.vector_store %arg16[%c0_40, %c0_41], %36 {strides = array<i32>} : memref<56x128xf32, #tpu.memory_space<vmem>>, vector<56x128xf32>,
    %c0_42 = arith.constant 0 : index
    %c0_43 = arith.constant 0 : index
    %38 = vector.load %arg16[%c0_42, %c0_43] : memref<56x128xf32, #tpu.memory_space<vmem>>, vector<56x128xf32>
    %c0_44 = arith.constant 0 : index
    %c0_45 = arith.constant 0 : index
    %39 = vector.load %arg5[%c0_44, %c0_45] : memref<1x128xf32, #tpu.memory_space<vmem>>, vector<1x128xf32>
    %40 = vector.broadcast %39 : vector<1x128xf32> to vector<56x128xf32>
    %41 = arith.addf %38, %40 : vector<56x128xf32>
    %cst_46 = arith.constant 0.000000e+00 : f32
    %42 = vector.broadcast %cst_46 : f32 to vector<56x128xf32>
    %43 = arith.maximumf %41, %42 : vector<56x128xf32>
    %44 = tpu.iota {dimensions = array<i32: 0>} : vector<56x1xi32>
    %45 = vector.broadcast %0 : i32 to vector<56x1xi32>
    %46 = arith.addi %44, %45 : vector<56x1xi32>
    %c2_i32 = arith.constant 2 : i32
    %47 = vector.broadcast %c2_i32 : i32 to vector<56x1xi32>
    %48 = arith.muli %47, %46 : vector<56x1xi32>
    %c21_i32 = arith.constant 21 : i32
    %49 = vector.broadcast %c21_i32 : i32 to vector<56x1xi32>
    %50 = arith.subi %48, %49 : vector<56x1xi32>
    %c2_i32_47 = arith.constant 2 : i32
    %51 = vector.broadcast %c2_i32_47 : i32 to vector<56x1xi32>
    %52 = arith.muli %51, %46 : vector<56x1xi32>
    %c20_i32 = arith.constant 20 : i32
    %53 = vector.broadcast %c20_i32 : i32 to vector<56x1xi32>
    %54 = arith.subi %52, %53 : vector<56x1xi32>
    %c0_i32 = arith.constant 0 : i32
    %55 = vector.broadcast %c0_i32 : i32 to vector<56x1xi32>
    %56 = arith.cmpi sge, %50, %55 : vector<56x1xi32>
    %c32_i32_48 = arith.constant 32 : i32
    %57 = vector.broadcast %c32_i32_48 : i32 to vector<56x1xi32>
    %58 = arith.cmpi slt, %50, %57 : vector<56x1xi32>
    %59 = arith.andi %56, %58 : vector<56x1xi1>
    %c64_i32 = arith.constant 64 : i32
    %60 = vector.broadcast %c64_i32 : i32 to vector<1x128xi32>
    %61 = arith.cmpi slt, %1, %60 : vector<1x128xi32>
    %62 = vector.broadcast %59 : vector<56x1xi1> to vector<56x128xi1>
    %63 = vector.broadcast %61 : vector<1x128xi1> to vector<56x128xi1>
    %64 = arith.andi %62, %63 : vector<56x128xi1>
    %c0_i32_49 = arith.constant 0 : i32
    %65 = vector.broadcast %c0_i32_49 : i32 to vector<56x1xi32>
    %66 = arith.cmpi sge, %54, %65 : vector<56x1xi32>
    %c32_i32_50 = arith.constant 32 : i32
    %67 = vector.broadcast %c32_i32_50 : i32 to vector<56x1xi32>
    %68 = arith.cmpi slt, %54, %67 : vector<56x1xi32>
    %69 = arith.andi %66, %68 : vector<56x1xi1>
    %c64_i32_51 = arith.constant 64 : i32
    %70 = vector.broadcast %c64_i32_51 : i32 to vector<1x128xi32>
    %71 = arith.cmpi sge, %1, %70 : vector<1x128xi32>
    %72 = vector.broadcast %69 : vector<56x1xi1> to vector<56x128xi1>
    %73 = vector.broadcast %71 : vector<1x128xi1> to vector<56x128xi1>
    %74 = arith.andi %72, %73 : vector<56x128xi1>
    %75 = arith.ori %64, %74 : vector<56x128xi1>
    %cst_52 = arith.constant 0.000000e+00 : f32
    %76 = vector.broadcast %cst_52 : f32 to vector<56x128xf32>
    %77 = arith.select %75, %43, %76 : vector<56x128xi1>, vector<56x128xf32>
    %78 = arith.truncf %77 : vector<56x128xf32> to vector<56x128xbf16>
    %c0_53 = arith.constant 0 : index
    %c0_54 = arith.constant 0 : index
    %79 = vector.load %arg17[%c0_53, %c0_54] : memref<56x128xbf16, #tpu.memory_space<vmem>>, vector<56x128xbf16>
    tpu.vector_store %arg17[%c0_53, %c0_54], %78 {strides = array<i32>} : memref<56x128xbf16, #tpu.memory_space<vmem>>, vector<56x128xbf16>,
    %c0_55 = arith.constant 0 : index
    %c0_56 = arith.constant 0 : index
    %80 = vector.load %arg17[%c0_55, %c0_56] : memref<56x128xbf16, #tpu.memory_space<vmem>>, vector<48x128xbf16>
    %c0_57 = arith.constant 0 : index
    %c0_58 = arith.constant 0 : index
    %c0_59 = arith.constant 0 : index
    %81 = vector.load %arg6[%c0_57, %c0_58, %c0_59] : memref<6x128x128xbf16, #tpu.memory_space<vmem>>, vector<1x128x128xbf16>
    %82 = vector.shape_cast %81 : vector<1x128x128xbf16> to vector<128x128xbf16>
    %cst_60 = arith.constant dense<0.000000e+00> : vector<48x128xf32>
    %83 = tpu.matmul %80, %82, %cst_60 {dimension_numbers = #tpu.dot_dimension_numbers<[1], [0], [0], [1], [0, 0, 1, 1], [], []>} : vector<48x128xbf16>, vector<128x128xbf16>, vector<48x128xf32> -> vector<48x128xf32>
    %c0_61 = arith.constant 0 : index
    %c0_62 = arith.constant 0 : index
    %84 = vector.load %arg16[%c0_61, %c0_62] : memref<56x128xf32, #tpu.memory_space<vmem>>, vector<48x128xf32>
    tpu.vector_store %arg16[%c0_61, %c0_62], %83 {strides = array<i32>} : memref<56x128xf32, #tpu.memory_space<vmem>>, vector<48x128xf32>,
    %c0_63 = arith.constant 0 : index
    %c0_64 = arith.constant 0 : index
    %85 = vector.load %arg16[%c0_63, %c0_64] : memref<56x128xf32, #tpu.memory_space<vmem>>, vector<48x128xf32>
    %c1_65 = arith.constant 1 : index
    %c0_66 = arith.constant 0 : index
    %86 = vector.load %arg17[%c1_65, %c0_66] : memref<56x128xbf16, #tpu.memory_space<vmem>>, vector<48x128xbf16>
    %c1_67 = arith.constant 1 : index
    %c0_68 = arith.constant 0 : index
    %c0_69 = arith.constant 0 : index
    %87 = vector.load %arg6[%c1_67, %c0_68, %c0_69] : memref<6x128x128xbf16, #tpu.memory_space<vmem>>, vector<1x128x128xbf16>
    %88 = vector.shape_cast %87 : vector<1x128x128xbf16> to vector<128x128xbf16>
    %cst_70 = arith.constant dense<0.000000e+00> : vector<48x128xf32>
    %89 = tpu.matmul %86, %88, %cst_70 {dimension_numbers = #tpu.dot_dimension_numbers<[1], [0], [0], [1], [0, 0, 1, 1], [], []>} : vector<48x128xbf16>, vector<128x128xbf16>, vector<48x128xf32> -> vector<48x128xf32>
    %90 = arith.addf %85, %89 : vector<48x128xf32>
    %c0_71 = arith.constant 0 : index
    %c0_72 = arith.constant 0 : index
    %91 = vector.load %arg16[%c0_71, %c0_72] : memref<56x128xf32, #tpu.memory_space<vmem>>, vector<48x128xf32>
    tpu.vector_store %arg16[%c0_71, %c0_72], %90 {strides = array<i32>} : memref<56x128xf32, #tpu.memory_space<vmem>>, vector<48x128xf32>,
    %c0_73 = arith.constant 0 : index
    %c0_74 = arith.constant 0 : index
    %92 = vector.load %arg16[%c0_73, %c0_74] : memref<56x128xf32, #tpu.memory_space<vmem>>, vector<48x128xf32>
    %c2_75 = arith.constant 2 : index
    %c0_76 = arith.constant 0 : index
    %93 = vector.load %arg17[%c2_75, %c0_76] : memref<56x128xbf16, #tpu.memory_space<vmem>>, vector<48x128xbf16>
    %c2_77 = arith.constant 2 : index
    %c0_78 = arith.constant 0 : index
    %c0_79 = arith.constant 0 : index
    %94 = vector.load %arg6[%c2_77, %c0_78, %c0_79] : memref<6x128x128xbf16, #tpu.memory_space<vmem>>, vector<1x128x128xbf16>
    %95 = vector.shape_cast %94 : vector<1x128x128xbf16> to vector<128x128xbf16>
    %cst_80 = arith.constant dense<0.000000e+00> : vector<48x128xf32>
    %96 = tpu.matmul %93, %95, %cst_80 {dimension_numbers = #tpu.dot_dimension_numbers<[1], [0], [0], [1], [0, 0, 1, 1], [], []>} : vector<48x128xbf16>, vector<128x128xbf16>, vector<48x128xf32> -> vector<48x128xf32>
    %97 = arith.addf %92, %96 : vector<48x128xf32>
    %c0_81 = arith.constant 0 : index
    %c0_82 = arith.constant 0 : index
    %98 = vector.load %arg16[%c0_81, %c0_82] : memref<56x128xf32, #tpu.memory_space<vmem>>, vector<48x128xf32>
    tpu.vector_store %arg16[%c0_81, %c0_82], %97 {strides = array<i32>} : memref<56x128xf32, #tpu.memory_space<vmem>>, vector<48x128xf32>,
    %c0_83 = arith.constant 0 : index
    %c0_84 = arith.constant 0 : index
    %99 = vector.load %arg16[%c0_83, %c0_84] : memref<56x128xf32, #tpu.memory_space<vmem>>, vector<48x128xf32>
    %c3_85 = arith.constant 3 : index
    %c0_86 = arith.constant 0 : index
    %100 = vector.load %arg17[%c3_85, %c0_86] : memref<56x128xbf16, #tpu.memory_space<vmem>>, vector<48x128xbf16>
    %c3_87 = arith.constant 3 : index
    %c0_88 = arith.constant 0 : index
    %c0_89 = arith.constant 0 : index
    %101 = vector.load %arg6[%c3_87, %c0_88, %c0_89] : memref<6x128x128xbf16, #tpu.memory_space<vmem>>, vector<1x128x128xbf16>
    %102 = vector.shape_cast %101 : vector<1x128x128xbf16> to vector<128x128xbf16>
    %cst_90 = arith.constant dense<0.000000e+00> : vector<48x128xf32>
    %103 = tpu.matmul %100, %102, %cst_90 {dimension_numbers = #tpu.dot_dimension_numbers<[1], [0], [0], [1], [0, 0, 1, 1], [], []>} : vector<48x128xbf16>, vector<128x128xbf16>, vector<48x128xf32> -> vector<48x128xf32>
    %104 = arith.addf %99, %103 : vector<48x128xf32>
    %c0_91 = arith.constant 0 : index
    %c0_92 = arith.constant 0 : index
    %105 = vector.load %arg16[%c0_91, %c0_92] : memref<56x128xf32, #tpu.memory_space<vmem>>, vector<48x128xf32>
    tpu.vector_store %arg16[%c0_91, %c0_92], %104 {strides = array<i32>} : memref<56x128xf32, #tpu.memory_space<vmem>>, vector<48x128xf32>,
    %c0_93 = arith.constant 0 : index
    %c0_94 = arith.constant 0 : index
    %106 = vector.load %arg16[%c0_93, %c0_94] : memref<56x128xf32, #tpu.memory_space<vmem>>, vector<48x128xf32>
    %c4 = arith.constant 4 : index
    %c0_95 = arith.constant 0 : index
    %107 = vector.load %arg17[%c4, %c0_95] : memref<56x128xbf16, #tpu.memory_space<vmem>>, vector<48x128xbf16>
    %c4_96 = arith.constant 4 : index
    %c0_97 = arith.constant 0 : index
    %c0_98 = arith.constant 0 : index
    %108 = vector.load %arg6[%c4_96, %c0_97, %c0_98] : memref<6x128x128xbf16, #tpu.memory_space<vmem>>, vector<1x128x128xbf16>
    %109 = vector.shape_cast %108 : vector<1x128x128xbf16> to vector<128x128xbf16>
    %cst_99 = arith.constant dense<0.000000e+00> : vector<48x128xf32>
    %110 = tpu.matmul %107, %109, %cst_99 {dimension_numbers = #tpu.dot_dimension_numbers<[1], [0], [0], [1], [0, 0, 1, 1], [], []>} : vector<48x128xbf16>, vector<128x128xbf16>, vector<48x128xf32> -> vector<48x128xf32>
    %111 = arith.addf %106, %110 : vector<48x128xf32>
    %c0_100 = arith.constant 0 : index
    %c0_101 = arith.constant 0 : index
    %112 = vector.load %arg16[%c0_100, %c0_101] : memref<56x128xf32, #tpu.memory_space<vmem>>, vector<48x128xf32>
    tpu.vector_store %arg16[%c0_100, %c0_101], %111 {strides = array<i32>} : memref<56x128xf32, #tpu.memory_space<vmem>>, vector<48x128xf32>,
    %c0_102 = arith.constant 0 : index
    %c0_103 = arith.constant 0 : index
    %113 = vector.load %arg16[%c0_102, %c0_103] : memref<56x128xf32, #tpu.memory_space<vmem>>, vector<48x128xf32>
    %c5 = arith.constant 5 : index
    %c0_104 = arith.constant 0 : index
    %114 = vector.load %arg17[%c5, %c0_104] : memref<56x128xbf16, #tpu.memory_space<vmem>>, vector<48x128xbf16>
    %c5_105 = arith.constant 5 : index
    %c0_106 = arith.constant 0 : index
    %c0_107 = arith.constant 0 : index
    %115 = vector.load %arg6[%c5_105, %c0_106, %c0_107] : memref<6x128x128xbf16, #tpu.memory_space<vmem>>, vector<1x128x128xbf16>
    %116 = vector.shape_cast %115 : vector<1x128x128xbf16> to vector<128x128xbf16>
    %cst_108 = arith.constant dense<0.000000e+00> : vector<48x128xf32>
    %117 = tpu.matmul %114, %116, %cst_108 {dimension_numbers = #tpu.dot_dimension_numbers<[1], [0], [0], [1], [0, 0, 1, 1], [], []>} : vector<48x128xbf16>, vector<128x128xbf16>, vector<48x128xf32> -> vector<48x128xf32>
    %118 = arith.addf %113, %117 : vector<48x128xf32>
    %c0_109 = arith.constant 0 : index
    %c0_110 = arith.constant 0 : index
    %119 = vector.load %arg16[%c0_109, %c0_110] : memref<56x128xf32, #tpu.memory_space<vmem>>, vector<48x128xf32>
    tpu.vector_store %arg16[%c0_109, %c0_110], %118 {strides = array<i32>} : memref<56x128xf32, #tpu.memory_space<vmem>>, vector<48x128xf32>,
    %c0_111 = arith.constant 0 : index
    %c0_112 = arith.constant 0 : index
    %120 = vector.load %arg16[%c0_111, %c0_112] : memref<56x128xf32, #tpu.memory_space<vmem>>, vector<48x128xf32>
    %c0_113 = arith.constant 0 : index
    %c0_114 = arith.constant 0 : index
    %121 = vector.load %arg7[%c0_113, %c0_114] : memref<1x128xf32, #tpu.memory_space<vmem>>, vector<1x128xf32>
    %122 = vector.broadcast %121 : vector<1x128xf32> to vector<48x128xf32>
    %123 = arith.addf %120, %122 : vector<48x128xf32>
    %cst_115 = arith.constant 0.000000e+00 : f32
    %124 = vector.broadcast %cst_115 : f32 to vector<48x128xf32>
    %125 = arith.maximumf %123, %124 : vector<48x128xf32>
    %126 = arith.truncf %125 : vector<48x128xf32> to vector<48x128xbf16>
    %c0_116 = arith.constant 0 : index
    %c0_117 = arith.constant 0 : index
    %127 = vector.load %arg8[%c0_116, %c0_117] : memref<128x128xbf16, #tpu.memory_space<vmem>>, vector<128x128xbf16>
    %cst_118 = arith.constant dense<0.000000e+00> : vector<48x128xf32>
    %128 = tpu.matmul %126, %127, %cst_118 {dimension_numbers = #tpu.dot_dimension_numbers<[1], [0], [0], [1], [0, 0, 1, 1], [], []>} : vector<48x128xbf16>, vector<128x128xbf16>, vector<48x128xf32> -> vector<48x128xf32>
    %c0_119 = arith.constant 0 : index
    %c0_120 = arith.constant 0 : index
    %129 = vector.load %arg9[%c0_119, %c0_120] : memref<1x128xf32, #tpu.memory_space<vmem>>, vector<1x128xf32>
    %130 = vector.broadcast %129 : vector<1x128xf32> to vector<48x128xf32>
    %131 = arith.addf %128, %130 : vector<48x128xf32>
    %132 = tpu.iota {dimensions = array<i32: 0>} : vector<48x1xi32>
    %c8_i32 = arith.constant 8 : i32
    %133 = arith.subi %0, %c8_i32 : i32
    %134 = vector.broadcast %133 : i32 to vector<48x1xi32>
    %135 = arith.addi %132, %134 : vector<48x1xi32>
    %c0_i32_121 = arith.constant 0 : i32
    %136 = vector.broadcast %c0_i32_121 : i32 to vector<48x1xi32>
    %137 = arith.cmpi sge, %135, %136 : vector<48x1xi32>
    %c16_i32 = arith.constant 16 : i32
    %138 = vector.broadcast %c16_i32 : i32 to vector<48x1xi32>
    %139 = arith.cmpi slt, %135, %138 : vector<48x1xi32>
    %140 = arith.andi %137, %139 : vector<48x1xi1>
    %cst_122 = arith.constant 0.000000e+00 : f32
    %141 = vector.shape_cast %140 : vector<48x1xi1> to vector<48x1xi1>
    %142 = vector.broadcast %141 : vector<48x1xi1> to vector<48x128xi1>
    %143 = vector.broadcast %cst_122 : f32 to vector<48x128xf32>
    %144 = arith.select %142, %131, %143 : vector<48x128xi1>, vector<48x128xf32>
    %c0_123 = arith.constant 0 : index
    %c0_124 = arith.constant 0 : index
    %145 = vector.load %arg18[%c0_123, %c0_124] : memref<48x128xf32, #tpu.memory_space<vmem>>, vector<48x128xf32>
    tpu.vector_store %arg18[%c0_123, %c0_124], %144 {strides = array<i32>} : memref<48x128xf32, #tpu.memory_space<vmem>>, vector<48x128xf32>,
    %cst_125 = arith.constant 0.000000e+00 : f32
    %146 = vector.broadcast %cst_125 : f32 to vector<32x128xf32>
    %c0_126 = arith.constant 0 : index
    %c0_127 = arith.constant 0 : index
    %147 = vector.load %arg11[%c0_126, %c0_127] : memref<1x128xf32, #tpu.memory_space<vmem>>, vector<1x128xf32>
    %148 = vector.broadcast %147 : vector<1x128xf32> to vector<32x128xf32>
    %149 = arith.addf %146, %148 : vector<32x128xf32>
    %c3_128 = arith.constant 3 : index
    %c0_129 = arith.constant 0 : index
    %150 = vector.load %arg18[%c3_128, %c0_129] : memref<48x128xf32, #tpu.memory_space<vmem>>, vector<32x128xf32>
    %c0_130 = arith.constant 0 : index
    %c0_131 = arith.constant 0 : index
    %151 = vector.load %arg10[%c0_130, %c0_131] : memref<16x128xf32, #tpu.memory_space<vmem>>, vector<1x128xf32>
    %152 = vector.broadcast %151 : vector<1x128xf32> to vector<32x128xf32>
    %153 = arith.mulf %150, %152 : vector<32x128xf32>
    %154 = arith.addf %149, %153 : vector<32x128xf32>
    %c4_132 = arith.constant 4 : index
    %c0_133 = arith.constant 0 : index
    %155 = vector.load %arg18[%c4_132, %c0_133] : memref<48x128xf32, #tpu.memory_space<vmem>>, vector<32x128xf32>
    %c1_134 = arith.constant 1 : index
    %c0_135 = arith.constant 0 : index
    %156 = vector.load %arg10[%c1_134, %c0_135] : memref<16x128xf32, #tpu.memory_space<vmem>>, vector<1x128xf32>
    %157 = vector.broadcast %156 : vector<1x128xf32> to vector<32x128xf32>
    %158 = arith.mulf %155, %157 : vector<32x128xf32>
    %159 = arith.addf %154, %158 : vector<32x128xf32>
    %c5_136 = arith.constant 5 : index
    %c0_137 = arith.constant 0 : index
    %160 = vector.load %arg18[%c5_136, %c0_137] : memref<48x128xf32, #tpu.memory_space<vmem>>, vector<32x128xf32>
    %c2_138 = arith.constant 2 : index
    %c0_139 = arith.constant 0 : index
    %161 = vector.load %arg10[%c2_138, %c0_139] : memref<16x128xf32, #tpu.memory_space<vmem>>, vector<1x128xf32>
    %162 = vector.broadcast %161 : vector<1x128xf32> to vector<32x128xf32>
    %163 = arith.mulf %160, %162 : vector<32x128xf32>
    %164 = arith.addf %159, %163 : vector<32x128xf32>
    %c6 = arith.constant 6 : index
    %c0_140 = arith.constant 0 : index
    %165 = vector.load %arg18[%c6, %c0_140] : memref<48x128xf32, #tpu.memory_space<vmem>>, vector<32x128xf32>
    %c3_141 = arith.constant 3 : index
    %c0_142 = arith.constant 0 : index
    %166 = vector.load %arg10[%c3_141, %c0_142] : memref<16x128xf32, #tpu.memory_space<vmem>>, vector<1x128xf32>
    %167 = vector.broadcast %166 : vector<1x128xf32> to vector<32x128xf32>
    %168 = arith.mulf %165, %167 : vector<32x128xf32>
    %169 = arith.addf %164, %168 : vector<32x128xf32>
    %c7 = arith.constant 7 : index
    %c0_143 = arith.constant 0 : index
    %170 = vector.load %arg18[%c7, %c0_143] : memref<48x128xf32, #tpu.memory_space<vmem>>, vector<32x128xf32>
    %c4_144 = arith.constant 4 : index
    %c0_145 = arith.constant 0 : index
    %171 = vector.load %arg10[%c4_144, %c0_145] : memref<16x128xf32, #tpu.memory_space<vmem>>, vector<1x128xf32>
    %172 = vector.broadcast %171 : vector<1x128xf32> to vector<32x128xf32>
    %173 = arith.mulf %170, %172 : vector<32x128xf32>
    %174 = arith.addf %169, %173 : vector<32x128xf32>
    %c8 = arith.constant 8 : index
    %c0_146 = arith.constant 0 : index
    %175 = vector.load %arg18[%c8, %c0_146] : memref<48x128xf32, #tpu.memory_space<vmem>>, vector<32x128xf32>
    %c5_147 = arith.constant 5 : index
    %c0_148 = arith.constant 0 : index
    %176 = vector.load %arg10[%c5_147, %c0_148] : memref<16x128xf32, #tpu.memory_space<vmem>>, vector<1x128xf32>
    %177 = vector.broadcast %176 : vector<1x128xf32> to vector<32x128xf32>
    %178 = arith.mulf %175, %177 : vector<32x128xf32>
    %179 = arith.addf %174, %178 : vector<32x128xf32>
    %c9 = arith.constant 9 : index
    %c0_149 = arith.constant 0 : index
    %180 = vector.load %arg18[%c9, %c0_149] : memref<48x128xf32, #tpu.memory_space<vmem>>, vector<32x128xf32>
    %c6_150 = arith.constant 6 : index
    %c0_151 = arith.constant 0 : index
    %181 = vector.load %arg10[%c6_150, %c0_151] : memref<16x128xf32, #tpu.memory_space<vmem>>, vector<1x128xf32>
    %182 = vector.broadcast %181 : vector<1x128xf32> to vector<32x128xf32>
    %183 = arith.mulf %180, %182 : vector<32x128xf32>
    %184 = arith.addf %179, %183 : vector<32x128xf32>
    %c10 = arith.constant 10 : index
    %c0_152 = arith.constant 0 : index
    %185 = vector.load %arg18[%c10, %c0_152] : memref<48x128xf32, #tpu.memory_space<vmem>>, vector<32x128xf32>
    %c7_153 = arith.constant 7 : index
    %c0_154 = arith.constant 0 : index
    %186 = vector.load %arg10[%c7_153, %c0_154] : memref<16x128xf32, #tpu.memory_space<vmem>>, vector<1x128xf32>
    %187 = vector.broadcast %186 : vector<1x128xf32> to vector<32x128xf32>
    %188 = arith.mulf %185, %187 : vector<32x128xf32>
    %189 = arith.addf %184, %188 : vector<32x128xf32>
    %c11 = arith.constant 11 : index
    %c0_155 = arith.constant 0 : index
    %190 = vector.load %arg18[%c11, %c0_155] : memref<48x128xf32, #tpu.memory_space<vmem>>, vector<32x128xf32>
    %c8_156 = arith.constant 8 : index
    %c0_157 = arith.constant 0 : index
    %191 = vector.load %arg10[%c8_156, %c0_157] : memref<16x128xf32, #tpu.memory_space<vmem>>, vector<1x128xf32>
    %192 = vector.broadcast %191 : vector<1x128xf32> to vector<32x128xf32>
    %193 = arith.mulf %190, %192 : vector<32x128xf32>
    %194 = arith.addf %189, %193 : vector<32x128xf32>
    %c12 = arith.constant 12 : index
    %c0_158 = arith.constant 0 : index
    %195 = vector.load %arg18[%c12, %c0_158] : memref<48x128xf32, #tpu.memory_space<vmem>>, vector<32x128xf32>
    %c9_159 = arith.constant 9 : index
    %c0_160 = arith.constant 0 : index
    %196 = vector.load %arg10[%c9_159, %c0_160] : memref<16x128xf32, #tpu.memory_space<vmem>>, vector<1x128xf32>
    %197 = vector.broadcast %196 : vector<1x128xf32> to vector<32x128xf32>
    %198 = arith.mulf %195, %197 : vector<32x128xf32>
    %199 = arith.addf %194, %198 : vector<32x128xf32>
    %c13 = arith.constant 13 : index
    %c0_161 = arith.constant 0 : index
    %200 = vector.load %arg18[%c13, %c0_161] : memref<48x128xf32, #tpu.memory_space<vmem>>, vector<32x128xf32>
    %c10_162 = arith.constant 10 : index
    %c0_163 = arith.constant 0 : index
    %201 = vector.load %arg10[%c10_162, %c0_163] : memref<16x128xf32, #tpu.memory_space<vmem>>, vector<1x128xf32>
    %202 = vector.broadcast %201 : vector<1x128xf32> to vector<32x128xf32>
    %203 = arith.mulf %200, %202 : vector<32x128xf32>
    %204 = arith.addf %199, %203 : vector<32x128xf32>
    %c8_164 = arith.constant 8 : index
    %c0_165 = arith.constant 0 : index
    %205 = vector.load %arg18[%c8_164, %c0_165] : memref<48x128xf32, #tpu.memory_space<vmem>>, vector<32x128xf32>
    %206 = arith.negf %204 : vector<32x128xf32>
    %207 = math.exp %206 : vector<32x128xf32>
    %cst_166 = arith.constant 1.000000e+00 : f32
    %208 = vector.broadcast %cst_166 : f32 to vector<32x128xf32>
    %209 = arith.addf %208, %207 : vector<32x128xf32>
    %210 = arith.divf %208, %209 : vector<32x128xf32>
    %211 = arith.mulf %205, %210 : vector<32x128xf32>
    %cst_167 = arith.constant dense<0.000000e+00> : vector<32xf32>
    %212 = vector.multi_reduction <add>, %211, %cst_167 [1] : vector<32x128xf32> to vector<32xf32>
    %213 = vector.shape_cast %212 : vector<32xf32> to vector<32x1xf32>
    %cst_168 = arith.constant 0.010416667 : f32
    %214 = vector.broadcast %cst_168 : f32 to vector<32x1xf32>
    %215 = arith.mulf %213, %214 : vector<32x1xf32>
    %c96_i32 = arith.constant 96 : i32
    %216 = vector.broadcast %c96_i32 : i32 to vector<1x128xi32>
    %217 = arith.cmpi slt, %1, %216 : vector<1x128xi32>
    %218 = vector.broadcast %215 : vector<32x1xf32> to vector<32x128xf32>
    %219 = arith.subf %211, %218 : vector<32x128xf32>
    %cst_169 = arith.constant 0.000000e+00 : f32
    %220 = vector.shape_cast %217 : vector<1x128xi1> to vector<1x128xi1>
    %221 = vector.broadcast %220 : vector<1x128xi1> to vector<32x128xi1>
    %222 = vector.broadcast %cst_169 : f32 to vector<32x128xf32>
    %223 = arith.select %221, %219, %222 : vector<32x128xi1>, vector<32x128xf32>
    %224 = arith.mulf %223, %223 : vector<32x128xf32>
    %cst_170 = arith.constant dense<0.000000e+00> : vector<32xf32>
    %225 = vector.multi_reduction <add>, %224, %cst_170 [1] : vector<32x128xf32> to vector<32xf32>
    %226 = vector.shape_cast %225 : vector<32xf32> to vector<32x1xf32>
    %cst_171 = arith.constant 0.010416667 : f32
    %227 = vector.broadcast %cst_171 : f32 to vector<32x1xf32>
    %228 = arith.mulf %226, %227 : vector<32x1xf32>
    %229 = vector.broadcast %215 : vector<32x1xf32> to vector<32x128xf32>
    %230 = arith.subf %211, %229 : vector<32x128xf32>
    %cst_172 = arith.constant 9.99999997E-7 : f32
    %231 = vector.broadcast %cst_172 : f32 to vector<32x1xf32>
    %232 = arith.addf %228, %231 : vector<32x1xf32>
    %233 = math.rsqrt %232 : vector<32x1xf32>
    %234 = vector.broadcast %233 : vector<32x1xf32> to vector<32x128xf32>
    %235 = arith.mulf %230, %234 : vector<32x128xf32>
    %c0_173 = arith.constant 0 : index
    %c0_174 = arith.constant 0 : index
    %236 = vector.load %arg12[%c0_173, %c0_174] : memref<1x128xf32, #tpu.memory_space<vmem>>, vector<1x128xf32>
    %237 = vector.broadcast %236 : vector<1x128xf32> to vector<32x128xf32>
    %238 = arith.mulf %235, %237 : vector<32x128xf32>
    %c0_175 = arith.constant 0 : index
    %c0_176 = arith.constant 0 : index
    %239 = vector.load %arg13[%c0_175, %c0_176] : memref<1x128xf32, #tpu.memory_space<vmem>>, vector<1x128xf32>
    %240 = vector.broadcast %239 : vector<1x128xf32> to vector<32x128xf32>
    %241 = arith.addf %238, %240 : vector<32x128xf32>
    %c0_177 = arith.constant 0 : index
    %c0_178 = arith.constant 0 : index
    %c0_179 = arith.constant 0 : index
    %242 = vector.load %arg14[%c0_177, %c0_178, %c0_179] : memref<1x32x128xf32, #tpu.memory_space<vmem>>, vector<1x32x128xf32>
    %243 = vector.shape_cast %242 : vector<1x32x128xf32> to vector<32x128xf32>
    %244 = vector.shape_cast %241 : vector<32x128xf32> to vector<1x32x128xf32>
    tpu.vector_store %arg14[%c0_177, %c0_178, %c0_179], %244 {strides = array<i32>} : memref<1x32x128xf32, #tpu.memory_space<vmem>>, vector<1x32x128xf32>,
    return
  }
  func.func @transform_0(%arg0: i32, %arg1: i32) -> (i32, i32, i32) {
    %c0_i32 = arith.constant 0 : i32
    %c0_i32_0 = arith.constant 0 : i32
    return %arg0, %arg1, %c0_i32 : i32, i32, i32
  }
  func.func @transform_1(%arg0: i32, %arg1: i32) -> (i32, i32, i32) {
    %c1_i32 = arith.constant 1 : i32
    %0 = arith.addi %arg1, %c1_i32 : i32
    %c1_i32_0 = arith.constant 1 : i32
    %1 = arith.muli %0, %c1_i32_0 : i32
    %c0_i32 = arith.constant 0 : i32
    %c0_i32_1 = arith.constant 0 : i32
    return %arg0, %1, %c0_i32 : i32, i32, i32
  }
  func.func @transform_2(%arg0: i32, %arg1: i32) -> (i32, i32, i32) {
    %c0_i32 = arith.constant 0 : i32
    %c0_i32_0 = arith.constant 0 : i32
    %c0_i32_1 = arith.constant 0 : i32
    %c0_i32_2 = arith.constant 0 : i32
    return %c0_i32, %c0_i32_0, %c0_i32_1 : i32, i32, i32
  }
  func.func @transform_3(%arg0: i32, %arg1: i32) -> (i32, i32) {
    %c0_i32 = arith.constant 0 : i32
    %c0_i32_0 = arith.constant 0 : i32
    %c0_i32_1 = arith.constant 0 : i32
    return %c0_i32, %c0_i32_0 : i32, i32
  }
  func.func @transform_4(%arg0: i32, %arg1: i32) -> (i32, i32, i32) {
    %c0_i32 = arith.constant 0 : i32
    %c0_i32_0 = arith.constant 0 : i32
    %c0_i32_1 = arith.constant 0 : i32
    %c0_i32_2 = arith.constant 0 : i32
    return %c0_i32, %c0_i32_0, %c0_i32_1 : i32, i32, i32
  }
  func.func @transform_5(%arg0: i32, %arg1: i32) -> (i32, i32) {
    %c0_i32 = arith.constant 0 : i32
    %c0_i32_0 = arith.constant 0 : i32
    %c0_i32_1 = arith.constant 0 : i32
    return %c0_i32, %c0_i32_0 : i32, i32
  }
  func.func @transform_6(%arg0: i32, %arg1: i32) -> (i32, i32) {
    %c0_i32 = arith.constant 0 : i32
    %c0_i32_0 = arith.constant 0 : i32
    %c0_i32_1 = arith.constant 0 : i32
    return %c0_i32, %c0_i32_0 : i32, i32
  }
  func.func @transform_7(%arg0: i32, %arg1: i32) -> (i32, i32) {
    %c0_i32 = arith.constant 0 : i32
    %c0_i32_0 = arith.constant 0 : i32
    %c0_i32_1 = arith.constant 0 : i32
    return %c0_i32, %c0_i32_0 : i32, i32
  }
  func.func @transform_8(%arg0: i32, %arg1: i32) -> (i32, i32) {
    %c0_i32 = arith.constant 0 : i32
    %c0_i32_0 = arith.constant 0 : i32
    %c0_i32_1 = arith.constant 0 : i32
    return %c0_i32, %c0_i32_0 : i32, i32
  }
  func.func @transform_9(%arg0: i32, %arg1: i32) -> (i32, i32) {
    %c0_i32 = arith.constant 0 : i32
    %c0_i32_0 = arith.constant 0 : i32
    %c0_i32_1 = arith.constant 0 : i32
    return %c0_i32, %c0_i32_0 : i32, i32
  }
  func.func @transform_10(%arg0: i32, %arg1: i32) -> (i32, i32) {
    %c0_i32 = arith.constant 0 : i32
    %c0_i32_0 = arith.constant 0 : i32
    %c0_i32_1 = arith.constant 0 : i32
    return %c0_i32, %c0_i32_0 : i32, i32
  }
  func.func @transform_11(%arg0: i32, %arg1: i32) -> (i32, i32) {
    %c0_i32 = arith.constant 0 : i32
    %c0_i32_0 = arith.constant 0 : i32
    %c0_i32_1 = arith.constant 0 : i32
    return %c0_i32, %c0_i32_0 : i32, i32
  }
  func.func @transform_12(%arg0: i32, %arg1: i32) -> (i32, i32, i32) {
    %c0_i32 = arith.constant 0 : i32
    %c0_i32_0 = arith.constant 0 : i32
    return %arg0, %arg1, %c0_i32 : i32, i32, i32
  }
}

</mosaic_0001>

<bundles_post_ra>
// kernel: conv_stem_forward.1
= control target key start
LH: loop header
LB: loop body
LE: loop exit
PB: predicated region body
PF: predicated region fallthrough
CT: control target
= control target key end

     0   :  { %s3690_s21 = smov 0   ;;  %s3692_s22 = smov 0   ;;  %s4466_s0 = inlined_call_operand.vmem [shape: f32[2,64,4], index: 0, kind: input, shape index: {}, may-alias: {0,1}]   ;;  %s4467_s1 = inlined_call_operand.vmem [shape: f32[2,64,4], index: 1, kind: input, shape index: {}, may-alias: {0,1}]   ;;  %s4468_s2 = inlined_call_operand.vmem [shape: bf16[4,4,128], index: 2, kind: input, shape index: {}]   ;;  %s4469_s3 = inlined_call_operand.vmem [shape: f32[1,128], index: 3, kind: input, shape index: {}]   ;;  %s4470_s4 = inlined_call_operand.vmem [shape: bf16[6,128,128], index: 4, kind: input, shape index: {}]   ;;  %s4471_s5 = inlined_call_operand.vmem [shape: f32[1,128], index: 5, kind: input, shape index: {}]   ;;  %s4472_s6 = inlined_call_operand.vmem [shape: bf16[128,128], index: 6, kind: input, shape index: {}]   ;;  %s4473_s7 = inlined_call_operand.vmem [shape: f32[1,128], index: 7, kind: input, shape index: {}]   ;;  %s4474_s8 = inlined_call_operand.vmem [shape: f32[16,128], index: 8, kind: input, shape index: {}]   ;;  %s4475_s9 = inlined_call_operand.vmem [shape: f32[1,128], index: 9, kind: input, shape index: {}]   ;;  %s4476_s10 = inlined_call_operand.vmem [shape: f32[1,128], index: 10, kind: input, shape index: {}]   ;;  %s4477_s11 = inlined_call_operand.vmem [shape: f32[1,128], index: 11, kind: input, shape index: {}]   ;;  %s4478_s12 = inlined_call_operand.vmem [shape: f32[2,32,128], index: 12, kind: output, shape index: {}]  }
   0x1   :  { %s3694_s23 = smov 0  }
   0x2 LB: > { %s34_s24 = sadd.s32 1, %s3617_s22  ;;  %p2874_p0 = scmp.ge.s32.totalorder %s3621_s23, 1  ;;  %s3621_s23 = sphi %s3694_s23, %s22_s23   ;;  %s3617_s22 = sphi %s3692_s22, %s4545_s22   ;;  %s3613_s21 = sphi %s3690_s21, %s4544_s21  }
   0x3   : > { %p36_p1 = scmp.ge.s32.totalorder %s34_s24, 2  ;;  %p404_p2 = scmp.lt.s32.totalorder %s3621_s23, 3 }
   0x5   : > { %s4547_s24 = smov (%p36_p1, %s34_s24), 0  ;;  %p405_p3 = pnand %p2874_p0, %p404_p2 }
   0x6   : > { %p465_p4 = scmp.lt.s32.totalorder (!%p405_p3), %s3613_s21, 1 }
   0x7   : > { %408 = sbr.rel (%p405_p3) target bundleno = 1134 (0x46e), region = 68 }
   0xc   : > { %v528_v0 = vld [vmem:[%s4468_s2] sm:$0x3]  ;;  %vm541_vm0 = vcmask 1041408   ;;  %v2885_v2 = vld [vmem:[%s4468_s2 + $0x2] sm:$0x3]  ;;  %s4549_s21 = smov (!%p465_p4, %s3613_s21), 1 }
   0xd   : > { %3465 = vmatprep.subr.msk.bf16.mxu1 %vm541_vm0, %v528_v0  ;;  %v543_v1 = vsel %vm541_vm0, %v528_v0, 0  ;;  %v2890_v3 = vld [vmem:[%s4468_s2 + $0x4] sm:$0x3]  ;;  %s3103_s13 = sshll.u32 %s4549_s21, 6  ;;  %vm504_vm1 = vcmask 31744   ;;  %v649_v21 = vsel %vm541_vm0, %v2885_v2, 0 }
   0xe   : > { %3230 = vmatpush3.bf16.msra.mxu1 %v543_v1  ;;  %3467 = vmatprep.subr.msk.bf16.mxu0 %vm541_vm0, %v2890_v3  ;;  %v762_v4 = vsel %vm541_vm0, %v2890_v3, 0  ;;  %s472_s16 = scalar_lea.vmem %s4466_s0, %s3103_s13  ;;  %s3105_s17 = sadd.s32 32, %s3103_s13  ;;  %v2895_v23 = vld [vmem:[%s4468_s2 + $0x6] sm:$0x3]  ;;  %v3495_v60 = vld [vmem:[%s4470_s4 + $0x38] sm:$0xff]   ;;  %v3623_v61 = vmov 0.0  }
   0xf   : > { %3466 = vmatprep.subr.msk.bf16.mxu1 %vm541_vm0, %v2885_v2  ;;  %3250 = vmatpush3.bf16.msra.mxu0 %v762_v4  ;;  %s483_s20 = scalar_lea.vmem %s4467_s1, %s3105_s17  ;;  %v500_v5 = vld [vmem:[%s472_s16] sm:$0xff]  ;;  %v501_v6 = vld [vmem:[%s472_s16 + $0x8] sm:$0xff]  ;;  %v502_v7 = vld [vmem:[%s472_s16 + $0x10] sm:$0xff]  ;;  %v875_v38 = vsel %vm541_vm0, %v2895_v23, 0  ;;  %2468 = vst [vmem:[#allocation5] sm:$0xff] %v3623_v61  ;;  %vm4479_vm2 = vmmov 0  }
  0x10   : > { %505 = vst.msk [vmem:[#allocation2] sm:$0xff] %vm504_vm1, %v500_v5  ;;  %506 = vst.msk [vmem:[#allocation2 + $0x8] sm:$0xff] %vm504_vm1, %v501_v6  ;;  %v503_v8 = vld [vmem:[%s472_s16 + $0x18] sm:$0xff]  ;;  %v509_v9 = vld [vmem:[%s483_s20] sm:$0xff]  ;;  %3269 = vmatprep.subr.bf16.mxu0 %v3623_v61  ;;  %s3106_s13 = sshll.u32 %s4549_s21, 5 }
  0x11   : > { %507 = vst.msk [vmem:[#allocation2 + $0x10] sm:$0xff] %vm504_vm1, %v502_v7  ;;  %v510_v10 = vld [vmem:[%s483_s20 + $0x8] sm:$0xff]  ;;  %508 = vst.msk [vmem:[#allocation2 + $0x18] sm:$0xff] %vm504_vm1, %v503_v8  ;;  %v511_v11 = vld [vmem:[%s483_s20 + $0x10] sm:$0xff]  ;;  %s494_s18 = scalar_lea.vmem %s4478_s12, %s3106_s13 }
  0x12   : > { %513 = vst.msk [vmem:[#allocation2 + $0x20] sm:$0xff] %vm504_vm1, %v509_v9  ;;  %514 = vst.msk [vmem:[#allocation2 + $0x28] sm:$0xff] %vm504_vm1, %v510_v10  ;;  %v512_v12 = vld [vmem:[%s483_s20 + $0x18] sm:$0xff]  ;;  %v3496_v62 = vld [vmem:[%s4470_s4 + $0x30] sm:$0xff]  }
  0x13   : > { %515 = vst.msk [vmem:[#allocation2 + $0x30] sm:$0xff] %vm504_vm1, %v511_v11  ;;  %516 = vst.msk [vmem:[#allocation2 + $0x38] sm:$0xff] %vm504_vm1, %v512_v12  ;;  %v3497_v63 = vld [vmem:[%s4470_s4 + $0x78] sm:$0xff]   ;;  %v3498_v0 = vld [vmem:[%s4470_s4 + $0x28] sm:$0xff]  }
  0x14   : > { %2471 = vst [vmem:[#allocation5 + $0x18] sm:$0xff] %v3623_v61  ;;  %2472 = vst [vmem:[#allocation5 + $0x20] sm:$0xff] %v3623_v61  ;;  %v3499_v1 = vld [vmem:[%s4470_s4 + $0x70] sm:$0xff]   ;;  %v3500_v2 = vld [vmem:[%s4470_s4 + $0x20] sm:$0xff]  }
  0x15   : > { %2473 = vst [vmem:[#allocation5 + $0x28] sm:$0xff] %v3623_v61  ;;  %v3501_v3 = vld [vmem:[%s4470_s4 + $0x68] sm:$0xff]   ;;  %v3502_v4 = vld [vmem:[%s4470_s4 + $0x18] sm:$0xff]   ;;  %v3503_v5 = vld [vmem:[%s4470_s4 + $0x60] sm:$0xff]  }
  0x16   : > { %v3504_v6 = vld [vmem:[%s4470_s4 + $0x10] sm:$0xff]   ;;  %v3505_v7 = vld [vmem:[%s4470_s4 + $0x58] sm:$0xff]   ;;  %v3506_v8 = vld [vmem:[%s4470_s4 + $0x8] sm:$0xff]  }
  0x17   : > { %v517_v13 = vld [vmem:[#allocation2] sm:$0xff]  ;;  %v518_v14 = vld [vmem:[#allocation2 + $0x8] sm:$0xff]  ;;  %v3507_v9 = vld [vmem:[%s4470_s4 + $0x50] sm:$0xff]  }
  0x18   : > { %v519_v15 = vld [vmem:[#allocation2 + $0x10] sm:$0xff]  ;;  %v524_v16 = vpack.c.bf16 %v518_v14, %v517_v13  ;;  %v520_v17 = vld [vmem:[#allocation2 + $0x18] sm:$0xff]  ;;  %v736_v24 = vld [vmem:[#allocation2 + $0x2] sm:$0xff]  ;;  %v498_v13 = vlaneseq }
  0x19   : > { %v521_v18 = vld [vmem:[#allocation2 + $0x20] sm:$0xff]  ;;  %v522_v19 = vld [vmem:[#allocation2 + $0x28] sm:$0xff]  ;;  %v525_v20 = vpack.c.bf16 %v520_v17, %v519_v15  ;;  %v738_v26 = vld [vmem:[#allocation2 + $0x12] sm:$0xff] }
  0x1a   : > { %v526_v22 = vpack.c.bf16 %v522_v19, %v521_v18  ;;  %3231 = vmatprep.mubr.msk.bf16.mxu1 %vm504_vm1, %v524_v16  ;;  %v737_v25 = vld [vmem:[#allocation2 + $0xa] sm:$0xff]  ;;  %v739_v27 = vld [vmem:[#allocation2 + $0x1a] sm:$0xff]  ;;  %v740_v33 = vld [vmem:[#allocation2 + $0x22] sm:$0xff]  ;;  %v3835_v14 = vshrl.u32 %v498_v13, 7 }
  0x1b   : > { %3232 = vmatmul.mubr.msk.bf16.vlgmr.msra.gmra.mxu1 %vm504_vm1, %v525_v20  ;;  %v523_v28 = vld [vmem:[#allocation2 + $0x30] sm:$0xff]  ;;  %v623_v29 = vld [vmem:[#allocation2 + $0x1] sm:$0xff]  ;;  %v743_v30 = vpack.c.bf16 %v737_v25, %v736_v24  ;;  %v744_v31 = vpack.c.bf16 %v739_v27, %v738_v26  ;;  %v626_v41 = vld [vmem:[#allocation2 + $0x19] sm:$0xff] }
  0x1c   : > { %3240 = vmatpush3.bf16.msra.mxu1 %v649_v21  ;;  %3235 = vmatprep.mubr.msk.bf16.mxu1 %vm504_vm1, %v526_v22  ;;  %v624_v32 = vld [vmem:[#allocation2 + $0x9] sm:$0xff]  ;;  %v527_v36 = vpack.c.bf16 %v523_v28, %v523_v28  ;;  %v742_v39 = vld [vmem:[#allocation2 + $0x32] sm:$0xff]  ;;  %v627_v42 = vld [vmem:[#allocation2 + $0x21] sm:$0xff]  ;;  %v986_v17 = vadd.s32 16, %v3835_v14  ;;  %v999_v25 = vmul.u32 2, %v3835_v14  ;;  %v987_v26 = vadd.s32 24, %v3835_v14 }
  0x1d   : > { %3468 = vmatprep.subr.msk.bf16.mxu1 %vm541_vm0, %v2895_v23  ;;  %v741_v34 = vld [vmem:[#allocation2 + $0x2a] sm:$0xff]  ;;  %3251 = vmatprep.mubr.msk.bf16.mxu0 %vm504_vm1, %v743_v30  ;;  %v630_v37 = vpack.c.bf16 %v624_v32, %v623_v29  ;;  %v746_v44 = vpack.c.bf16 %v742_v39, %v742_v39  ;;  %v851_v52 = vld [vmem:[#allocation2 + $0x13] sm:$0xff]  ;;  %v852_v53 = vld [vmem:[#allocation2 + $0x1b] sm:$0xff] }
  0x1e   : > { %v745_v35 = vpack.c.bf16 %v741_v34, %v740_v33  ;;  %3252 = vmatmul.mubr.msk.bf16.vlgmr.msra.gmra.mxu0 %vm504_vm1, %v744_v31  ;;  %v625_v40 = vld [vmem:[#allocation2 + $0x11] sm:$0xff]  ;;  %v628_v43 = vld [vmem:[#allocation2 + $0x29] sm:$0xff]  ;;  %v857_v56 = vpack.c.bf16 %v852_v53, %v851_v52  ;;  %v3508_v10 = vld [vmem:[%s4470_s4] sm:$0xff]   ;;  %v1001_v22 = vmul.u32 2, %v986_v17  ;;  %v2901_v33 = vadd.s32 4294967275, %v999_v25 }
  0x1f   : > { %v631_v45 = vpack.c.bf16 %v626_v41, %v625_v40  ;;  %v632_v46 = vpack.c.bf16 %v628_v43, %v627_v42  ;;  %v629_v47 = vld [vmem:[#allocation2 + $0x31] sm:$0xff]  ;;  %v849_v48 = vld [vmem:[#allocation2 + $0x3] sm:$0xff]  ;;  %3270 = vmatpush3.bf16.msra.mxu0 %v3495_v60  ;;  %v1002_v34 = vmul.u32 2, %v987_v26  ;;  %v988_v53 = vadd.s32 32, %v3835_v14 }
  0x20   : > { %3255 = vmatprep.mubr.msk.bf16.mxu0 %vm504_vm1, %v745_v35  ;;  %v850_v49 = vld [vmem:[#allocation2 + $0xb] sm:$0xff]  ;;  %v633_v50 = vpack.c.bf16 %v629_v47, %v629_v47  ;;  %v853_v54 = vld [vmem:[#allocation2 + $0x23] sm:$0xff]  ;;  %v855_v58 = vld [vmem:[#allocation2 + $0x33] sm:$0xff]  ;;  %3271 = vmatprep.subr.bf16.mxu0 %v3623_v61  ;;  %v2903_v29 = vadd.s32 4294967275, %v1001_v22  ;;  %v2910_v32 = vadd.s32 4294967276, %v1001_v22  ;;  %v985_v35 = vadd.s32 8, %v3835_v14 }
  0x21   : > { %v856_v51 = vpack.c.bf16 %v850_v49, %v849_v48  ;;  %v854_v55 = vld [vmem:[#allocation2 + $0x2b] sm:$0xff]  ;;  %v859_v59 = vpack.c.bf16 %v855_v58, %v855_v58  ;;  %v3512_v12 = vld [vmem:[%s4470_s4 + $0x40] sm:$0xff]   ;;  %vm1020_vm7 = vcmp.ge.s32.totalorder %v2901_v33, 0  ;;  %vm1027_vm8 = vcmp.lt.s32.totalorder %v2901_v33, 32 }
  0x22   : > { %v858_v57 = vpack.c.bf16 %v854_v55, %v853_v54  ;;  %v3509_v11 = vld [vmem:[%s4470_s4 + $0x48] sm:$0xff]   ;;  %vm1022_vm3 = vcmp.ge.s32.totalorder %v2903_v29, 0  ;;  %vm1029_vm4 = vcmp.lt.s32.totalorder %v2903_v29, 32  ;;  %vm1067_vm5 = vcmp.ge.s32.totalorder %v2910_v32, 0  ;;  %vm1034_vm13 = vmand %vm1020_vm7, %vm1027_vm8 }
  0x23   : > { %3236 = vmatmul.mubr.msk.bf16.gmra.mxu1 %vm504_vm1, %v527_v36  ;;  %3272 = vmatpush3.bf16.msra.mxu0 %v3496_v62  ;;  %vm1074_vm6 = vcmp.lt.s32.totalorder %v2910_v32, 32  ;;  %v2904_v41 = vadd.s32 4294967275, %v1002_v34  ;;  %v1000_v42 = vmul.u32 2, %v985_v35  ;;  %vm1036_vm9 = vmand %vm1022_vm3, %vm1029_vm4  ;;  %v1003_v60 = vmul.u32 2, %v988_v53  ;;  %v3518_v32 = vld [vmem:[%s4470_s4 + $0xa8] sm:$0xff]  }
  0x24   : > { %3241 = vmatprep.mubr.msk.bf16.mxu1 %vm504_vm1, %v630_v37  ;;  %3273 = vmatprep.subr.bf16.mxu0 %v3623_v61  ;;  %vm1081_vm11 = vmand %vm1067_vm5, %vm1074_vm6  ;;  %v989_v62 = vadd.s32 40, %v3835_v14 }
  0x25   : > { %vm1023_vm15 = vcmp.ge.s32.totalorder %v2904_v41, 0  ;;  %vm1030_vm0 = vcmp.lt.s32.totalorder %v2904_v41, 32  ;;  %v2902_v49 = vadd.s32 4294967275, %v1000_v42 }
  0x26   : > { %3256 = vmatmul.mubr.msk.bf16.gmra.mxu0 %vm504_vm1, %v746_v44  ;;  %v2908_v44 = vadd.s32 4294967276, %v999_v25  ;;  %vm1037_vm8 = vmand %vm1023_vm15, %vm1030_vm0 }
  0x27   : > { %3274 = vmatpush3.bf16.msra.mxu0 %v3498_v0  ;;  %3285 = vmatprep.mubr.msk.bf16.mxu0 %vm4479_vm2, %v3623_v61 }
  0x28   : > { %3275 = vmatprep.subr.bf16.mxu0 %v3623_v61  ;;  %vm1065_vm3 = vcmp.ge.s32.totalorder %v2908_v44, 0  ;;  %vm1072_vm4 = vcmp.lt.s32.totalorder %v2908_v44, 32 }
  0x2b   : > { %3242 = vmatmul.mubr.msk.bf16.vlgmr.msra.gmra.mxu1 %vm504_vm1, %v631_v45  ;;  %3276 = vmatpush3.bf16.msra.mxu0 %v3500_v2  ;;  %v990_v45 = vadd.s32 48, %v3835_v14 }
  0x2c   : > { %3260 = vmatpush3.bf16.msra.mxu1 %v875_v38  ;;  %3245 = vmatprep.mubr.msk.bf16.mxu1 %vm504_vm1, %v632_v46  ;;  %v3867_v38 = vand.u32 127, %v498_v13  ;;  %v2911_v46 = vadd.s32 4294967276, %v1002_v34  ;;  %v3933_v13 = vld [vmem:[%s4469_s3] ss:$0 sm:$0xff] }
  0x2d   : > { %3297 = vmatprep.subr.bf16.mxu1 %v3623_v61  ;;  %3277 = vmatprep.subr.bf16.mxu0 %v3623_v61  ;;  %v1005_v52 = vmul.u32 2, %v990_v45 }
  0x2e   : > { %vm4482_vm10 = vcmp.lt.s32.totalorder %v3867_v38, 64  ;;  %vm4481_vm12 = vcmp.ge.s32.totalorder %v3867_v38, 64  ;;  %vm1068_vm6 = vcmp.ge.s32.totalorder %v2911_v46, 0  ;;  %vm1075_vm7 = vcmp.lt.s32.totalorder %v2911_v46, 32 }
  0x2f   : > { %3278 = vmatpush3.bf16.msra.mxu0 %v3502_v4  ;;  %vm3874_vm14 = vmand %vm1036_vm9, %vm4482_vm10  ;;  %vm4496_vm0 = vcmp.ge.s32.totalorder %v3867_v38, 64  ;;  %v4497_v4 = vmov 0 }
  0x30   : > { %3279 = vmatprep.subr.bf16.mxu0 %v3623_v61  ;;  %vm3887_vm5 = vmand %vm1034_vm13, %vm4482_vm10 }
  0x31   : > { %vm3891_vm9 = vmand %vm1065_vm3, %vm1072_vm4 }
  0x32   : > { %vm3899_vm13 = vmand %vm1037_vm8, %vm4482_vm10 }
  0x33   : > { %3246 = vmatmul.mubr.msk.bf16.gmra.mxu1 %vm504_vm1, %v633_v50  ;;  %3280 = vmatpush3.bf16.msra.mxu0 %v3504_v6  ;;  %v4500_v6 = vmov 0 }
  0x34   : > { %3261 = vmatprep.mubr.msk.bf16.mxu1 %vm504_vm1, %v856_v51  ;;  %3281 = vmatprep.subr.bf16.mxu0 %v3623_v61 }
  0x37   : > { %3282 = vmatpush3.bf16.msra.mxu0 %v3506_v8  ;;  %v1004_v8 = vmul.u32 2, %v989_v62 }
  0x38   : > { %3283 = vmatprep.subr.bf16.mxu0 %v3623_v61 }
  0x3b   : > { %3262 = vmatmul.mubr.msk.bf16.vlgmr.msra.gmra.mxu1 %vm504_vm1, %v857_v56  ;;  %3284 = vmatpush3.bf16.msra.mxu0 %v3508_v10 }
  0x3c   : > { %3265 = vmatprep.mubr.msk.bf16.mxu1 %vm504_vm1, %v858_v57  ;;  %3298 = vmatpush3.bf16.msra.mxu1 %v3497_v63  ;;  %v2909_v57 = vadd.s32 4294967276, %v1000_v42 }
  0x3d   : > { %3299 = vmatprep.subr.bf16.mxu1 %v3623_v61  ;;  %3325 = vmatprep.subr.bf16.mxu0 %v3623_v61 }
  0x3e   : > { %vm1066_vm4 = vcmp.ge.s32.totalorder %v2909_v57, 0 }
  0x40   : > { %3300 = vmatpush3.bf16.msra.mxu1 %v3499_v1  ;;  %v2914_v1 = vadd.s32 4294967276, %v1005_v52 }
  0x41   : > { %3301 = vmatprep.subr.bf16.mxu1 %v3623_v61 }
  0x43   : > { %3266 = vmatmul.mubr.msk.bf16.gmra.mxu1 %vm504_vm1, %v859_v59  ;;  %vm3880_vm1 = vmand %vm1081_vm11, %vm4481_vm12  ;;  %vm1021_vm11 = vcmp.ge.s32.totalorder %v2902_v49, 0  ;;  %v2907_v59 = vadd.s32 4294967275, %v1005_v52 }
  0x44   : > { %3302 = vmatpush3.bf16.msra.mxu1 %v3501_v3  ;;  %3313 = vmatprep.mubr.msk.bf16.mxu1 %vm4479_vm2, %v3623_v61  ;;  %vm1028_vm2 = vcmp.lt.s32.totalorder %v2902_v49, 32  ;;  %vm1082_vm12 = vmand %vm1068_vm6, %vm1075_vm7  ;;  %vm1073_vm6 = vcmp.lt.s32.totalorder %v2909_v57, 32 }
  0x45   : > { %3303 = vmatprep.subr.bf16.mxu1 %v3623_v61  ;;  %vm1035_vm15 = vmand %vm1021_vm11, %vm1028_vm2  ;;  %vm1033_vm11 = vcmp.lt.s32.totalorder %v2907_v59, 32 }
  0x46   : > { %vm3906_vm3 = vmand %vm1082_vm12, %vm4496_vm0 }
  0x47   : > { %v4498_v4 = vsel %vm3906_vm3, 4294967295, %v4497_v4  ;;  %vm4499_vm7 = vmmov %vm4496_vm0 }
  0x48   : > { %3304 = vmatpush3.bf16.msra.mxu1 %v3503_v5  ;;  %vm3914_vm8 = vmand %vm3891_vm9, %vm4499_vm7  ;;  %vm1071_vm9 = vcmp.ge.s32.totalorder %v2914_v1, 0  ;;  %vm1078_vm7 = vcmp.lt.s32.totalorder %v2914_v1, 32 }
  0x49   : > { %3305 = vmatprep.subr.bf16.mxu1 %v3623_v61  ;;  %v4501_v6 = vsel %vm3914_vm8, 4294967295, %v4500_v6  ;;  %vm3926_vm0 = vmand %vm1035_vm15, %vm4482_vm10  ;;  %vm4506_vm15 = vcmp.ge.s32.totalorder %v2907_v59, 0  ;;  %vm4526_vm8 = vnez %v4498_v4 }
  0x4a   : > { %vm3941_vm12 = vmand %vm1066_vm4, %vm1073_vm6 }
  0x4b   : > { %vm3949_vm10 = vmand %vm4506_vm15, %vm1033_vm11  ;;  %vm4511_vm11 = vcmp.ge.s32.totalorder %v3867_v38, 64 }
  0x4c   : > { %3306 = vmatpush3.bf16.msra.mxu1 %v3505_v7  ;;  %v2905_v7 = vadd.s32 4294967275, %v1003_v60  ;;  %vm3957_vm6 = vmand %vm1071_vm9, %vm1078_vm7  ;;  %vm4514_vm9 = vcmp.lt.s32.totalorder %v3867_v38, 64 }
  0x4d   : > { %3307 = vmatprep.subr.bf16.mxu1 %v3623_v61  ;;  %vm3968_vm15 = vmand %vm3941_vm12, %vm4511_vm11 }
  0x4e   : > { %vm1024_vm2 = vcmp.ge.s32.totalorder %v2905_v7, 0  ;;  %vm1031_vm3 = vcmp.lt.s32.totalorder %v2905_v7, 32  ;;  %vm3977_vm7 = vmand %vm3949_vm10, %vm4514_vm9 }
  0x4f   : > { %vm4517_vm12 = vmmov %vm4511_vm11 }
  0x50   : > { %3308 = vmatpush3.bf16.msra.mxu1 %v3507_v9  ;;  %vm3987_vm11 = vmand %vm3957_vm6, %vm4517_vm12  ;;  %vm4522_vm6 = vcmp.lt.s32.totalorder %v3867_v38, 64 }
  0x51   : > { %3309 = vmatprep.subr.bf16.mxu1 %v3623_v61  ;;  %vm3993_vm10 = vmand %vm1024_vm2, %vm1031_vm3 }
  0x52   : > { %vm4014_vm12 = vmand %vm3993_vm10, %vm4522_vm6 }
  0x53   : > { %vm4525_vm3 = vmor %vm3874_vm14, %vm3880_vm1 }
  0x54   : > { %3310 = vmatpush3.bf16.msra.mxu1 %v3509_v11  ;;  %v3511_v11 = vld [vmem:[%s4470_s4 + $0xb8] sm:$0xff]  }
  0x55   : > { %3311 = vmatprep.subr.bf16.mxu1 %v3623_v61 }
  0x58   : > { %3312 = vmatpush3.bf16.msra.mxu1 %v3512_v12 }
  0x59   : > { %3353 = vmatprep.subr.bf16.mxu1 %v3623_v61 }
  0xdb   : > { %v3837_v15 = vpop.f32.mrf.mxu1 }
  0xdd   : > { %v3839_v16 = vpop.f32.mrf.mxu1 }
  0xde   : > { %v3844_v19 = vpop.f32.mrf.mxu0 }
  0xdf   : > { %v3842_v18 = vpop.f32.mrf.mxu1 }
  0xe0   : > { %v3848_v21 = vpop.f32.mrf.mxu0 }
  0xe1   : > { %v3846_v20 = vpop.f32.mrf.mxu1 }
  0xe2   : > { %v3852_v24 = vpop.f32.mrf.mxu0 }
  0xe3   : > { %v3850_v23 = vpop.f32.mrf.mxu1 }
  0xe4   : > { %v3858_v28 = vpop.f32.mrf.mxu0 }
  0xe5   : > { %v3856_v27 = vpop.f32.mrf.mxu1 }
  0xe6   : > { %v3860_v31 = vpop.f32.mrf.mxu0 }
  0xe7   : > { %v3238_v30 = vpop.f32.mrf.mxu1 }
  0xe8   : > { %v3865_v37 = vpop.f32.mrf.mxu0 }
  0xe9   : > { %v3863_v36 = vpop.f32.mrf.mxu1 }
  0xea   : > { %v3258_v40 = vpop.f32.mrf.mxu0 }
  0xeb   : > { %v3243_v39 = vpop.f32.mrf.mxu1 }
  0xec   : > { %v717_v63 = vadd.f32 %v3243_v39, %v3837_v15 }
  0xed   : > { %v685_v43 = vpop.f32.mrf.mxu1 }
  0xee   : > { %v715_v3 = vadd.f32 %v685_v43, %v3839_v16  ;;  %v830_v9 = vadd.f32 %v3844_v19, %v717_v63 }
  0xef   : > { %v3244_v47 = vpop.f32.mrf.mxu1 }
  0xf0   : > { %v718_v10 = vadd.f32 %v3244_v47, %v3842_v18  ;;  %v828_v15 = vadd.f32 %v3848_v21, %v715_v3  ;;  %v2912_v21 = vadd.s32 4294967276, %v1003_v60 }
  0xf1   : > { %v688_v50 = vpop.f32.mrf.mxu1 }
  0xf2   : > { %v716_v16 = vadd.f32 %v688_v50, %v3846_v20  ;;  %v2906_v20 = vadd.s32 4294967275, %v1004_v8  ;;  %v831_v25 = vadd.f32 %v3852_v24, %v718_v10  ;;  %v2913_v24 = vadd.s32 4294967276, %v1004_v8 }
  0xf3   : > { %v3247_v55 = vpop.f32.mrf.mxu1  ;;  %vm1069_vm9 = vcmp.ge.s32.totalorder %v2912_v21, 0  ;;  %vm1076_vm4 = vcmp.lt.s32.totalorder %v2912_v21, 32 }
  0xf4   : > { %v721_v26 = vadd.f32 %v3247_v55, %v3850_v23  ;;  %v829_v35 = vadd.f32 %v3858_v28, %v716_v16  ;;  %vm1083_vm2 = vmand %vm1069_vm9, %vm1076_vm4  ;;  %vm4528_vm10 = vcmp.lt.s32.totalorder %v2906_v20, 32  ;;  %vm4529_vm6 = vcmp.ge.s32.totalorder %v2906_v20, 0 }
  0xf5   : > { %v701_v58 = vpop.f32.mrf.mxu1  ;;  %vm4530_vm14 = vcmp.lt.s32.totalorder %v2913_v24, 32  ;;  %vm4531_vm1 = vcmp.ge.s32.totalorder %v2913_v24, 0  ;;  %vm4532_vm4 = vnez %v4501_v6  ;;  %v3519_v24 = vld [vmem:[%s4470_s4 + $0xf0] sm:$0xff]  }
  0xf6   : > { %v719_v33 = vadd.f32 %v701_v58, %v3856_v27  ;;  %v4518_v27 = vmov 0  ;;  %v834_v28 = vadd.f32 %v3860_v31, %v721_v26  ;;  %v817_v31 = vpop.f32.mrf.mxu0  ;;  %vm4533_vm9 = vmor %vm3887_vm5, %vm4532_vm4  ;;  %vm4538_vm5 = vcmp.lt.s32.totalorder %v3867_v38, 64 }
  0xf7   : > { %v3248_v2 = vpop.f32.mrf.mxu1  ;;  %v4519_v27 = vsel %vm3987_vm11, 4294967295, %v4518_v27  ;;  %vm4527_vm11 = vmor %vm3899_vm13, %vm4526_vm8  ;;  %vm4535_vm8 = vcmp.ge.s32.totalorder %v3867_v38, 64  ;;  %vm1556_vm4 = vcmask 1046528  }
  0xf8   : > { %v832_v46 = vadd.f32 %v3865_v37, %v719_v33  ;;  %vm4534_vm13 = vmor %vm3926_vm0, %vm3968_vm15  ;;  %vm4539_vm0 = vnez %v4519_v27 }
  0xf9   : > { %v704_v5 = vpop.f32.mrf.mxu1  ;;  %vm4540_vm15 = vmor %vm3977_vm7, %vm4539_vm0  ;;  %vm4543_vm7 = vmmov 0  }
  0xfa   : > { %v720_v47 = vadd.f32 %v704_v5, %v3863_v36  ;;  %v4523_v36 = vmov 0 }
  0xfb   : > { %v3263_v12 = vpop.f32.mrf.mxu1  ;;  %v4524_v36 = vsel %vm4014_vm12, 4294967295, %v4523_v36  ;;  %vm1039_vm12 = vmand %vm4529_vm6, %vm4528_vm10 }
  0xfc   : > { %v943_v17 = vadd.f32 %v3263_v12, %v830_v9  ;;  %v833_v48 = vadd.f32 %v817_v31, %v720_v47  ;;  %vm1063_vm10 = vmand %vm1039_vm12, %vm4538_vm5 }
  0xfd   : > { %v911_v19 = vpop.f32.mrf.mxu1  ;;  %vm4541_vm6 = vmmov %vm4535_vm8 }
  0xfe   : > { %v971_v29 = vadd.f32 %v3933_v13, %v943_v17  ;;  %v941_v30 = vadd.f32 %v911_v19, %v828_v15  ;;  %v3513_v19 = vld [vmem:[%s4470_s4 + $0xb0] sm:$0xff]  }
  0xff   : > { %v3264_v34 = vpop.f32.mrf.mxu1 }
 0x100   : > { %v969_v39 = vadd.f32 %v3933_v13, %v941_v30  ;;  %v944_v40 = vadd.f32 %v3264_v34, %v831_v25  ;;  %v978_v41 = vmax.f32 %v971_v29, 0.0  ;;  %v3516_v25 = vld [vmem:[%s4470_s4 + $0xf8] sm:$0xff]  }
 0x101   : > { %v914_v42 = vpop.f32.mrf.mxu1 }
 0x102   : > { %v972_v44 = vadd.f32 %v3933_v13, %v944_v40  ;;  %v942_v45 = vadd.f32 %v914_v42, %v829_v35  ;;  %v976_v50 = vmax.f32 %v969_v39, 0.0  ;;  %v1119_v37 = vsel %vm4525_vm3, %v978_v41, 0.0  ;;  %vm1084_vm3 = vmand %vm4531_vm1, %vm4530_vm14  ;;  %v3520_v35 = vld [vmem:[%s4470_s4 + $0xa0] sm:$0xff]   ;;  %v3522_v41 = vld [vmem:[%s4470_s4 + $0xe8] sm:$0xff]  }
 0x103   : > { %v3267_v49 = vpop.f32.mrf.mxu1  ;;  %vm1108_vm14 = vmand %vm1084_vm3, %vm4541_vm6  ;;  %vm1359_vm3 = vsmask.f32 7424  ;;  %v3524_v42 = vld [vmem:[%s4470_s4 + $0x98] sm:$0xff]  }
 0x104   : > { %v979_v52 = vmax.f32 %v972_v44, 0.0  ;;  %v970_v53 = vadd.f32 %v3933_v13, %v942_v45  ;;  %v947_v55 = vadd.f32 %v3267_v49, %v834_v28  ;;  %v1117_v63 = vsel %vm4533_vm9, %v976_v50, 0.0  ;;  %vm1115_vm12 = vmor %vm1063_vm10, %vm1108_vm14  ;;  %v3525_v45 = vld [vmem:[%s4470_s4 + $0xe0] sm:$0xff]  }
 0x105   : > { %v927_v56 = vpop.f32.mrf.mxu1  ;;  %vm1732_vm9 = vsmask.f32 6400 }
 0x106   : > { %v1120_v57 = vsel %vm4527_vm11, %v979_v52, 0.0  ;;  %v977_v58 = vmax.f32 %v970_v53, 0.0  ;;  %v975_v59 = vadd.f32 %v3933_v13, %v947_v55  ;;  %v945_v60 = vadd.f32 %v927_v56, %v832_v46  ;;  %vm4048_vm11 = vmand %vm1083_vm2, %vm4535_vm8  ;;  %v3526_v46 = vld [vmem:[%s4470_s4 + $0x90] sm:$0xff]   ;;  %v3528_v52 = vld [vmem:[%s4470_s4 + $0xd8] sm:$0xff]  }
 0x107   : > { %v3122_v51 = vpack.c.bf16 %v1120_v57, %v1119_v37  ;;  %v3268_v62 = vpop.f32.mrf.mxu1  ;;  %vm4542_vm2 = vnez %v4524_v36  ;;  %v3529_v53 = vld [vmem:[%s4470_s4 + $0x88] sm:$0xff]   ;;  %v3530_v56 = vld [vmem:[%s4470_s4 + $0xd0] sm:$0xff]   ;;  %v3531_v57 = vld [vmem:[%s4470_s4 + $0x80] sm:$0xff]   ;;  %vm2112_vm8 = vsmask.f32 5376 }
 0x108   : > { %v1118_v0 = vsel %vm4534_vm13, %v977_v58, 0.0  ;;  %v982_v1 = vmax.f32 %v975_v59, 0.0  ;;  %v973_v2 = vadd.f32 %v3933_v13, %v945_v60  ;;  %vm1114_vm1 = vmor %vm4542_vm2, %vm4048_vm11  ;;  %vm1936_vm13 = vcmask 1045504  }
 0x109   : > { %3130 = vst [vmem:[#allocation4 + $0x8] sm:$0xff] %v3122_v51   ;;  %v3117_v54 = vpack.c.bf16 %v1118_v0, %v1117_v63  ;;  %v930_v4 = vpop.f32.mrf.mxu1  ;;  %v3534_v63 = vld [vmem:[%s4470_s4 + $0xc8] sm:$0xff]   ;;  %v3535_v0 = vld [vmem:[%s4470_s4 + $0x138] sm:$0xff]   ;;  %vm2700_vm11 = vcmp.lt.s32.totalorder %v3867_v38, 96 }
 0x10a   : > { %v1123_v5 = vsel %vm4540_vm15, %v982_v1, 0.0  ;;  %v946_v6 = vadd.f32 %v930_v4, %v833_v48  ;;  %v980_v8 = vmax.f32 %v973_v2, 0.0 }
 0x10b   : > { %3118 = vst [vmem:[#allocation4] sm:$0xff] %v3117_v54   ;;  %v3113_v7 = vpack.c.bf16 %v1123_v5, %v1123_v5 }
 0x10c   : > { %v974_v9 = vadd.f32 %v3933_v13, %v946_v6  ;;  %v1121_v12 = vsel %vm1114_vm1, %v980_v8, 0.0  ;;  %v3537_v8 = vld [vmem:[%s4470_s4 + $0x130] sm:$0xff]  }
 0x10d   : > { %1159 = vst [vmem:[#allocation4 + $0x18] sm:$0xf] %v3113_v7  ;;  %v3536_v7 = vld [vmem:[%s4470_s4 + $0xc0] sm:$0xff]  }
 0x10e   : > { %v981_v10 = vmax.f32 %v974_v9, 0.0 }
 0x110   : > { %v1122_v14 = vsel %vm1115_vm12, %v981_v10, 0.0  ;;  %v3515_v16 = vld [vmem:[#allocation4 + $0x8] sm:$0xff]  }
 0x111   : > { %v3127_v15 = vpack.c.bf16 %v1122_v14, %v1121_v12  ;;  %v1368_v22 = vshll.u32 %v3515_v16, 16  ;;  %v3517_v30 = vld [vmem:[#allocation4 + $0x8] sm:$0xff]   ;;  %v1372_v39 = vshrl.u32 %v3515_v16, 16 }
 0x112   : > { %v3510_v17 = vld [vmem:[#allocation4] sm:$0xff]   ;;  %v3533_v58 = vld [vmem:[#allocation4 + $0x8] sm:$0xff]  }
 0x113   : > { %3131 = vst [vmem:[#allocation4 + $0x10] sm:$0xff] %v3127_v15   ;;  %v3514_v18 = vld [vmem:[#allocation4] sm:$0xff]   ;;  %3286 = vmatmul.mubr.bf16.vlgmr.msra.gmra.mxu0 %v3510_v17  ;;  %v1370_v29 = vrot.slane %v1368_v22, 1  ;;  %v3539_v59 = vld [vmem:[#allocation4 + $0x8] sm:$0xff]   ;;  %v1558_v62 = vrot.slane %v3533_v58, 1  ;;  %v3541_v17 = vld [vmem:[%s4470_s4 + $0x178] sm:$0xff]  }
 0x114   : > { %3326 = vmatpush3.bf16.msra.mxu0 %v3511_v11  ;;  %3289 = vmatprep.mubr.msk.bf16.mxu0 %vm4543_vm7, %v3623_v61  ;;  %v1363_v13 = vshll.u32 %v3514_v18, 16  ;;  %v1361_v21 = vshrl.u32 %v3514_v18, 16  ;;  %v3527_v43 = vld [vmem:[#allocation4 + $0x18] ss:$0 sps:$4 sm:$0x11]   ;;  %v1742_v1 = vshrl.u32 %v3539_v59, 16 }
 0x115   : > { %3327 = vmatprep.subr.bf16.mxu0 %v3623_v61  ;;  %v1374_v27 = vor.u32 %v1372_v39, %v1370_v29  ;;  %v1384_v49 = vshll.u32 %v3527_v43, 16  ;;  %v3532_v36 = vld [vmem:[#allocation4] sm:$0xfe]   ;;  %v1745_v2 = vshll.u32 %v3539_v59, 16  ;;  %v3542_v18 = vld [vmem:[%s4470_s4 + $0x128] sm:$0xff]  }
 0x116   : > { %v1365_v20 = vrot.slane %v1363_v13, 1  ;;  %v3538_v37 = vld [vmem:[#allocation4] sm:$0xfe]   ;;  %v1557_v60 = vrot.slane %v3532_v36, 1  ;;  %v1744_v9 = vrot.slane %v1742_v1, 1 }
 0x117   : > { %v1386_v50 = vrot.slane %v1384_v49, 1  ;;  %v1734_v48 = vshrl.u32 %v3538_v37, 16  ;;  %v1737_v51 = vshll.u32 %v3538_v37, 16  ;;  %v1747_v10 = vrot.slane %v1745_v2, 2  ;;  %v3554_v49 = vld [vmem:[%s4470_s4 + $0x150] sm:$0xff]  }
 0x118   : > { %3328 = vmatpush3.bf16.msra.mxu0 %v3513_v19  ;;  %v1366_v26 = vor.u32 %v1365_v20, %v1361_v21  ;;  %v1559_v3 = vsel %vm1556_vm4, %v1557_v60, %v1558_v62  ;;  %v3543_v20 = vld [vmem:[%s4470_s4 + $0x170] sm:$0xff]  }
 0x119   : > { %3329 = vmatprep.subr.bf16.mxu0 %v3623_v61  ;;  %v1736_v54 = vrot.slane %v1734_v48, 1  ;;  %v1739_v4 = vrot.slane %v1737_v51, 2  ;;  %v1748_v16 = vor.u32 %v1747_v10, %v1744_v9  ;;  %v3564_v10 = vld [vmem:[#allocation4 + $0x18] ss:$0 sps:$4 sm:$0x33]  }
 0x11a   : > { %v3521_v33 = vld [vmem:[#allocation4 + $0x10] sm:$0xff]   ;;  %v1371_v34 = vsel %vm1359_vm3, %v1366_v26, %v1370_v29  ;;  %v3546_v26 = vld [vmem:[#allocation4 + $0x18] ss:$0 sps:$4 sm:$0x11]  }
 0x11b   : > { %3314 = vmatmul.mubr.bf16.vlgmr.msra.gmra.mxu1 %v1371_v34  ;;  %3290 = vmatmul.mubr.bf16.gmra.mxu0 %v3517_v30  ;;  %v1376_v23 = vshll.u32 %v3521_v33, 16  ;;  %v3523_v28 = vld [vmem:[#allocation4 + $0x10] sm:$0xff]   ;;  %v1380_v47 = vshrl.u32 %v3521_v33, 16  ;;  %v1740_v11 = vor.u32 %v1739_v4, %v1736_v54  ;;  %v3551_v29 = vld [vmem:[#allocation4 + $0x18] ss:$0 sps:$4 sm:$0x33]  }
 0x11c   : > { %3354 = vmatpush3.bf16.msra.mxu1 %v3516_v25  ;;  %3330 = vmatpush3.bf16.msra.mxu0 %v3518_v32  ;;  %v3540_v5 = vld [vmem:[#allocation4 + $0x10] sm:$0xff]   ;;  %v3544_v25 = vld [vmem:[%s4470_s4 + $0x120] sm:$0xff]   ;;  %v1562_v32 = vrot.slane %v3546_v26, 1  ;;  %v3547_v33 = vld [vmem:[%s4470_s4 + $0x168] sm:$0xff]  }
 0x11d   : > { %3355 = vmatprep.subr.bf16.mxu1 %v3623_v61  ;;  %3331 = vmatprep.subr.bf16.mxu0 %v3623_v61  ;;  %v1378_v40 = vrot.slane %v1376_v23, 1  ;;  %v3545_v6 = vld [vmem:[#allocation4 + $0x10] sm:$0xff]   ;;  %v1560_v12 = vrot.slane %v3540_v5, 1  ;;  %v1749_v19 = vsel %vm1732_vm9, %v1740_v11, %v1748_v16  ;;  %v3548_v34 = vld [vmem:[%s4470_s4 + $0x118] sm:$0xff]   ;;  %v1760_v23 = vshrl.u32 %v3551_v29, 16 }
 0x11e   : > { %3317 = vmatprep.mubr.msk.bf16.mxu1 %vm4543_vm7, %v3623_v61  ;;  %3293 = vmatprep.mubr.msk.bf16.mxu0 %vm4543_vm7, %v3623_v61  ;;  %v1751_v14 = vshrl.u32 %v3545_v6, 16  ;;  %v1754_v15 = vshll.u32 %v3545_v6, 16  ;;  %v3562_v51 = vld [vmem:[#allocation4 + $0x10] sm:$0xff]   ;;  %v3565_v11 = vld [vmem:[#allocation4 + $0x18] ss:$0 sps:$4 sm:$0x77]  }
 0x11f   : > { %v1379_v44 = vsel %vm1359_vm3, %v1374_v27, %v1378_v40  ;;  %v1382_v31 = vor.u32 %v1380_v47, %v1378_v40  ;;  %v1561_v13 = vsel %vm1556_vm4, %v1558_v62, %v1560_v12  ;;  %v1563_v39 = vsel %vm1556_vm4, %v1560_v12, %v1562_v32  ;;  %v3549_v40 = vld [vmem:[%s4470_s4 + $0x160] sm:$0xff]   ;;  %v3550_v27 = vld [vmem:[%s4470_s4 + $0x110] sm:$0xff]  }
 0x120   : > { %3356 = vmatpush3.bf16.msra.mxu1 %v3519_v24  ;;  %3332 = vmatpush3.bf16.msra.mxu0 %v3520_v35  ;;  %v1753_v22 = vrot.slane %v1751_v14, 1  ;;  %v1756_v21 = vrot.slane %v1754_v15, 2  ;;  %v1763_v24 = vshll.u32 %v3551_v29, 16  ;;  %v3560_v47 = vld [vmem:[#allocation4] sm:$0xfc]   ;;  %v3563_v62 = vld [vmem:[#allocation4 + $0x10] sm:$0xff]  }
 0x121   : > { %3357 = vmatprep.subr.bf16.mxu1 %v3623_v61  ;;  %3333 = vmatprep.subr.bf16.mxu0 %v3623_v61  ;;  %v1387_v55 = vsel %vm1359_vm3, %v1382_v31, %v1386_v50  ;;  %v3555_v31 = vld [vmem:[%s4470_s4 + $0x100] sm:$0xff]   ;;  %v3557_v50 = vld [vmem:[#allocation4 + $0x8] sm:$0xff]   ;;  %v2117_v36 = vshll.u32 %v3560_v47, 16  ;;  %v2131_v54 = vshrl.u32 %v3563_v62, 16  ;;  %v2134_v4 = vshll.u32 %v3563_v62, 16  ;;  %v3571_v32 = vld [vmem:[%s4472_s6 + $0x10] sm:$0xff]  }
 0x122   : > { %v1757_v30 = vor.u32 %v1756_v21, %v1753_v22  ;;  %v1938_v37 = vrot.slane %v3557_v50, 2  ;;  %v1942_v14 = vrot.slane %v3564_v10, 2  ;;  %v2140_v15 = vshrl.u32 %v3565_v11, 16  ;;  %v4249_v26 = vld [vmem:[#allocation5] sm:$0xff]  ;;  %v3568_v29 = vld [vmem:[%s4472_s6 + $0x28] sm:$0xff]  }
 0x123   : > { %3318 = vmatmul.mubr.bf16.gmra.mxu1 %v1379_v44  ;;  %3294 = vmatmul.mubr.bf16.gmra.mxu0 %v3523_v28  ;;  %v3552_v28 = vld [vmem:[%s4470_s4 + $0x158] sm:$0xff]   ;;  %v3553_v44 = vld [vmem:[%s4470_s4 + $0x108] sm:$0xff]   ;;  %v2119_v48 = vrot.slane %v2117_v36, 3  ;;  %v2136_v9 = vrot.slane %v2134_v4, 3 }
 0x124   : > { %3358 = vmatpush3.bf16.msra.mxu1 %v3522_v41  ;;  %3334 = vmatpush3.bf16.msra.mxu0 %v3524_v42  ;;  %v1758_v35 = vsel %vm1732_vm9, %v1748_v16, %v1757_v30  ;;  %v1762_v41 = vrot.slane %v1760_v23, 1  ;;  %v1765_v42 = vrot.slane %v1763_v24, 2  ;;  %v2143_v16 = vshll.u32 %v3565_v11, 16 }
 0x125   : > { %3359 = vmatprep.subr.bf16.mxu1 %v3623_v61  ;;  %3335 = vmatprep.subr.bf16.mxu0 %v3623_v61 }
 0x126   : > { %3321 = vmatprep.mubr.msk.bf16.mxu1 %vm4543_vm7, %v3623_v61  ;;  %3341 = vmatprep.mubr.msk.bf16.mxu0 %vm4543_vm7, %v3623_v61  ;;  %v1766_v43 = vor.u32 %v1765_v42, %v1762_v41 }
 0x128   : > { %3360 = vmatpush3.bf16.msra.mxu1 %v3525_v45  ;;  %3336 = vmatpush3.bf16.msra.mxu0 %v3526_v46  ;;  %v1767_v45 = vsel %vm1732_vm9, %v1757_v30, %v1766_v43  ;;  %v3556_v46 = vld [vmem:[#allocation4] sm:$0xfc]   ;;  %v3570_v30 = vld [vmem:[%s4472_s6 + $0x18] sm:$0xff]  }
 0x129   : > { %3361 = vmatprep.subr.bf16.mxu1 %v3623_v61  ;;  %3337 = vmatprep.subr.bf16.mxu0 %v3623_v61 }
 0x12b   : > { %3322 = vmatmul.mubr.bf16.gmra.mxu1 %v1387_v55  ;;  %v2114_v55 = vshrl.u32 %v3560_v47, 16 }
 0x12c   : > { %3362 = vmatpush3.bf16.msra.mxu1 %v3528_v52  ;;  %3338 = vmatpush3.bf16.msra.mxu0 %v3529_v53  ;;  %v3561_v52 = vld [vmem:[#allocation4 + $0x8] sm:$0xff]   ;;  %v1937_v53 = vrot.slane %v3556_v46, 2 }
 0x12d   : > { %3363 = vmatprep.subr.bf16.mxu1 %v3623_v61  ;;  %3339 = vmatprep.subr.bf16.mxu0 %v3623_v61  ;;  %v2125_v58 = vshll.u32 %v3561_v52, 16  ;;  %v2116_v60 = vrot.slane %v2114_v55, 2 }
 0x12e   : > { %3369 = vmatprep.mubr.msk.bf16.mxu1 %vm4543_vm7, %v3623_v61  ;;  %v1939_v59 = vsel %vm1936_vm13, %v1937_v53, %v1938_v37 }
 0x12f   : > { %v2127_v1 = vrot.slane %v2125_v58, 3  ;;  %v2120_v2 = vor.u32 %v2119_v48, %v2116_v60 }
 0x130   : > { %3364 = vmatpush3.bf16.msra.mxu1 %v3530_v56  ;;  %3340 = vmatpush3.bf16.msra.mxu0 %v3531_v57  ;;  %v3558_v56 = vld [vmem:[%s4470_s4 + $0x148] sm:$0xff]   ;;  %v2122_v57 = vshrl.u32 %v3561_v52, 16 }
 0x131   : > { %3365 = vmatprep.subr.bf16.mxu1 %v3623_v61  ;;  %3381 = vmatprep.subr.bf16.mxu0 %v3623_v61 }
 0x133   : > { %3342 = vmatmul.mubr.bf16.vlgmr.msra.gmra.mxu0 %v1559_v3  ;;  %v1940_v3 = vrot.slane %v3562_v51, 2 }
 0x134   : > { %3366 = vmatpush3.bf16.msra.mxu1 %v3534_v63  ;;  %3382 = vmatpush3.bf16.msra.mxu0 %v3535_v0  ;;  %v3559_v63 = vld [vmem:[%s4470_s4 + $0x140] sm:$0xff]   ;;  %v2124_v0 = vrot.slane %v2122_v57, 2 }
 0x135   : > { %3367 = vmatprep.subr.bf16.mxu1 %v3623_v61  ;;  %3383 = vmatprep.subr.bf16.mxu0 %v3623_v61 }
 0x136   : > { %3345 = vmatprep.mubr.msk.bf16.mxu0 %vm4543_vm7, %v3623_v61  ;;  %v2128_v5 = vor.u32 %v2127_v1, %v2124_v0 }
 0x138   : > { %3368 = vmatpush3.bf16.msra.mxu1 %v3536_v7  ;;  %3384 = vmatpush3.bf16.msra.mxu0 %v3537_v8  ;;  %v2129_v6 = vsel %vm2112_vm8, %v2120_v2, %v2128_v5  ;;  %v1941_v7 = vsel %vm1936_vm13, %v1938_v37, %v1940_v3  ;;  %v2133_v8 = vrot.slane %v2131_v54, 2 }
 0x139   : > { %3409 = vmatprep.subr.bf16.mxu1 %v3623_v61  ;;  %3385 = vmatprep.subr.bf16.mxu0 %v3623_v61 }
 0x13a   : > { %v2137_v12 = vor.u32 %v2136_v9, %v2133_v8 }
 0x13b   : > { %3370 = vmatmul.mubr.bf16.vlgmr.msra.gmra.mxu1 %v1749_v19  ;;  %3346 = vmatmul.mubr.bf16.gmra.mxu0 %v1561_v13  ;;  %v2142_v19 = vrot.slane %v2140_v15, 2  ;;  %v2145_v13 = vrot.slane %v2143_v16, 3 }
 0x13c   : > { %3410 = vmatpush3.bf16.msra.mxu1 %v3541_v17  ;;  %3386 = vmatpush3.bf16.msra.mxu0 %v3542_v18  ;;  %v2138_v17 = vsel %vm2112_vm8, %v2128_v5, %v2137_v12  ;;  %v1943_v18 = vsel %vm1936_vm13, %v1940_v3, %v1942_v14 }
 0x13d   : > { %3411 = vmatprep.subr.bf16.mxu1 %v3623_v61  ;;  %3387 = vmatprep.subr.bf16.mxu0 %v3623_v61  ;;  %v2146_v22 = vor.u32 %v2145_v13, %v2142_v19 }
 0x13e   : > { %3373 = vmatprep.mubr.msk.bf16.mxu1 %vm4543_vm7, %v3623_v61  ;;  %3349 = vmatprep.mubr.msk.bf16.mxu0 %vm4543_vm7, %v3623_v61 }
 0x13f   : > { %v2147_v21 = vsel %vm2112_vm8, %v2137_v12, %v2146_v22 }
 0x140   : > { %3412 = vmatpush3.bf16.msra.mxu1 %v3543_v20  ;;  %3388 = vmatpush3.bf16.msra.mxu0 %v3544_v25  ;;  %v3566_v20 = vld [vmem:[%s4472_s6 + $0x38] sm:$0xff]   ;;  %v3567_v25 = vld [vmem:[%s4472_s6 + $0x30] sm:$0xff]  }
 0x141   : > { %3413 = vmatprep.subr.bf16.mxu1 %v3623_v61  ;;  %3389 = vmatprep.subr.bf16.mxu0 %v3623_v61 }
 0x143   : > { %3374 = vmatmul.mubr.bf16.gmra.mxu1 %v1758_v35  ;;  %3350 = vmatmul.mubr.bf16.gmra.mxu0 %v1563_v39 }
 0x144   : > { %3414 = vmatpush3.bf16.msra.mxu1 %v3547_v33  ;;  %3390 = vmatpush3.bf16.msra.mxu0 %v3548_v34  ;;  %v3572_v33 = vld [vmem:[%s4472_s6 + $0x8] sm:$0xff]   ;;  %v3573_v34 = vld [vmem:[%s4472_s6] sm:$0xff]  }
 0x145   : > { %3415 = vmatprep.subr.bf16.mxu1 %v3623_v61  ;;  %3391 = vmatprep.subr.bf16.mxu0 %v3623_v61 }
 0x146   : > { %3377 = vmatprep.mubr.msk.bf16.mxu1 %vm4543_vm7, %v3623_v61  ;;  %3397 = vmatprep.mubr.msk.bf16.mxu0 %vm4543_vm7, %v3623_v61 }
 0x148   : > { %3416 = vmatpush3.bf16.msra.mxu1 %v3549_v40  ;;  %3392 = vmatpush3.bf16.msra.mxu0 %v3550_v27 }
 0x149   : > { %3417 = vmatprep.subr.bf16.mxu1 %v3623_v61  ;;  %3393 = vmatprep.subr.bf16.mxu0 %v3623_v61 }
 0x14b   : > { %3378 = vmatmul.mubr.bf16.gmra.mxu1 %v1767_v45 }
 0x14c   : > { %3418 = vmatpush3.bf16.msra.mxu1 %v3552_v28  ;;  %3394 = vmatpush3.bf16.msra.mxu0 %v3553_v44 }
 0x14d   : > { %3419 = vmatprep.subr.bf16.mxu1 %v3623_v61  ;;  %3395 = vmatprep.subr.bf16.mxu0 %v3623_v61 }
 0x14e   : > { %3425 = vmatprep.mubr.msk.bf16.mxu1 %vm4543_vm7, %v3623_v61 }
 0x150   : > { %3420 = vmatpush3.bf16.msra.mxu1 %v3554_v49  ;;  %3396 = vmatpush3.bf16.msra.mxu0 %v3555_v31 }
 0x151   : > { %3421 = vmatprep.subr.bf16.mxu1 %v3623_v61  ;;  %3437 = vmatprep.subr.bf16.mxu0 %v3623_v61 }
 0x153   : > { %3398 = vmatmul.mubr.bf16.vlgmr.msra.gmra.mxu0 %v1939_v59 }
 0x154   : > { %3422 = vmatpush3.bf16.msra.mxu1 %v3558_v56  ;;  %3401 = vmatprep.mubr.msk.bf16.mxu0 %vm4543_vm7, %v3623_v61 }
 0x155   : > { %3423 = vmatprep.subr.bf16.mxu1 %v3623_v61  ;;  %3438 = vmatpush3.bf16.msra.mxu0 %v3566_v20 }
 0x156   : > { %3439 = vmatprep.subr.bf16.mxu0 %v3623_v61 }
 0x158   : > { %3424 = vmatpush3.bf16.msra.mxu1 %v3559_v63 }
 0x159   : > { %3440 = vmatpush3.bf16.msra.mxu0 %v3567_v25 }
 0x15a   : > { %3441 = vmatprep.subr.bf16.mxu0 %v4249_v26 }
 0x15b   : > { %3426 = vmatmul.mubr.bf16.vlgmr.msra.gmra.mxu1 %v2129_v6  ;;  %3402 = vmatmul.mubr.bf16.gmra.mxu0 %v1941_v7 }
 0x15c   : > { %3429 = vmatprep.mubr.msk.bf16.mxu1 %vm4543_vm7, %v3623_v61  ;;  %3405 = vmatprep.mubr.msk.bf16.mxu0 %vm4543_vm7, %v3623_v61 }
 0x15d   : > { %3442 = vmatpush3.bf16.msra.mxu0 %v3568_v29 }
 0x15e   : > { %3443 = vmatprep.subr.bf16.mxu0 %v4249_v26 }
 0x163   : > { %3430 = vmatmul.mubr.bf16.gmra.mxu1 %v2138_v17  ;;  %3406 = vmatmul.mubr.bf16.gmra.mxu0 %v1943_v18 }
 0x164   : > { %3433 = vmatprep.mubr.msk.bf16.mxu1 %vm4543_vm7, %v3623_v61  ;;  %3453 = vmatprep.mubr.msk.bf16.mxu0 %vm4543_vm7, %v3623_v61  ;;  %v3569_v61 = vld [vmem:[%s4472_s6 + $0x20] sm:$0xff]  }
 0x165   : > { %3444 = vmatpush3.bf16.msra.mxu0 %v3569_v61 }
 0x166   : > { %3445 = vmatprep.subr.bf16.mxu0 %v4249_v26 }
 0x169   : > { %3446 = vmatpush3.bf16.msra.mxu0 %v3570_v30 }
 0x16a   : > { %3447 = vmatprep.subr.bf16.mxu0 %v4249_v26 }
 0x16b   : > { %3434 = vmatmul.mubr.bf16.gmra.mxu1 %v2147_v21 }
 0x16d   : > { %3448 = vmatpush3.bf16.msra.mxu0 %v3571_v32 }
 0x16e   : > { %3449 = vmatprep.subr.bf16.mxu0 %v4249_v26 }
 0x171   : > { %3450 = vmatpush3.bf16.msra.mxu0 %v3572_v33 }
 0x172   : > { %3451 = vmatprep.subr.bf16.mxu0 %v4249_v26 }
 0x175   : > { %3452 = vmatpush3.bf16.msra.mxu0 %v3573_v34 }
 0x1d3   : > { %v1282_v23 = vpop.f32.mrf.mxu0 }
 0x1d5   : > { %v3287_v24 = vpop.f32.mrf.mxu0 }
 0x1d7   : > { %v1285_v35 = vpop.f32.mrf.mxu0 }
 0x1d9   : > { %v3288_v39 = vpop.f32.mrf.mxu0 }
 0x1da   : > { %v3073_v39 = vld [vmem:[%s4471_s5] ss:$0 sm:$0xff] }
 0x1db   : > { %v1473_v40 = vpop.f32.mrf.mxu1  ;;  %v1290_v27 = vpop.f32.mrf.mxu0 }
 0x1dc   : > { %v1496_v18 = vadd.f32 %v1473_v40, %v1282_v23 }
 0x1dd   : > { %v3315_v41 = vpop.f32.mrf.mxu1  ;;  %v3291_v42 = vpop.f32.mrf.mxu0 }
 0x1df   : > { %v1476_v43 = vpop.f32.mrf.mxu1  ;;  %v1293_v28 = vpop.f32.mrf.mxu0 }
 0x1e0   : > { %v1497_v21 = vadd.f32 %v1476_v43, %v1285_v35 }
 0x1e1   : > { %v3316_v44 = vpop.f32.mrf.mxu1  ;;  %v3292_v45 = vpop.f32.mrf.mxu0 }
 0x1e3   : > { %v1481_v46 = vpop.f32.mrf.mxu1  ;;  %v4275_v47 = vpop.f32.mrf.mxu0 }
 0x1e4   : > { %v1498_v33 = vadd.f32 %v1481_v46, %v1290_v27 }
 0x1e5   : > { %v3319_v49 = vpop.f32.mrf.mxu1  ;;  %v3295_v31 = vpop.f32.mrf.mxu0 }
 0x1e7   : > { %v1484_v50 = vpop.f32.mrf.mxu1  ;;  %v4277_v52 = vpop.f32.mrf.mxu0 }
 0x1e8   : > { %v1499_v35 = vadd.f32 %v1484_v50, %v1293_v28 }
 0x1e9   : > { %v3320_v53 = vpop.f32.mrf.mxu1  ;;  %v3296_v55 = vpop.f32.mrf.mxu0 }
 0x1eb   : > { %v1489_v36 = vpop.f32.mrf.mxu1 }
 0x1ed   : > { %v3323_v37 = vpop.f32.mrf.mxu1 }
 0x1ef   : > { %v4279_v56 = vpop.f32.mrf.mxu1 }
 0x1f1   : > { %v3324_v57 = vpop.f32.mrf.mxu1 }
 0x1f2   : > { %v1500_v57 = vadd.f32 %v1489_v36, %v4275_v47 }
 0x1f3   : > { %v1649_v58 = vpop.f32.mrf.mxu0 }
 0x1f4   : > { %v1672_v13 = vadd.f32 %v1649_v58, %v1496_v18 }
 0x1f5   : > { %v3343_v59 = vpop.f32.mrf.mxu0 }
 0x1f7   : > { %v1652_v60 = vpop.f32.mrf.mxu0 }
 0x1f8   : > { %v1673_v29 = vadd.f32 %v1652_v60, %v1497_v21 }
 0x1f9   : > { %v3344_v48 = vpop.f32.mrf.mxu0 }
 0x1fb   : > { %v1853_v51 = vpop.f32.mrf.mxu1  ;;  %v1657_v62 = vpop.f32.mrf.mxu0 }
 0x1fc   : > { %v1876_v20 = vadd.f32 %v1853_v51, %v1672_v13  ;;  %v1674_v23 = vadd.f32 %v1657_v62, %v1498_v33  ;;  %v4302_v33 = vld [vmem:[%s4475_s9] ss:$0 sm:$0xff] }
 0x1fd   : > { %v3371_v63 = vpop.f32.mrf.mxu1  ;;  %v3347_v0 = vpop.f32.mrf.mxu0 }
 0x1ff   : > { %v1856_v1 = vpop.f32.mrf.mxu1  ;;  %v1660_v2 = vpop.f32.mrf.mxu0 }
 0x200   : > { %v1877_v34 = vadd.f32 %v1856_v1, %v1673_v29  ;;  %v1675_v37 = vadd.f32 %v1660_v2, %v1499_v35  ;;  %v1501_v2 = vadd.f32 %v4279_v56, %v4277_v52 }
 0x201   : > { %v3372_v3 = vpop.f32.mrf.mxu1  ;;  %v3348_v54 = vpop.f32.mrf.mxu0 }
 0x203   : > { %v1861_v4 = vpop.f32.mrf.mxu1  ;;  %v1665_v5 = vpop.f32.mrf.mxu0 }
 0x204   : > { %v1878_v43 = vadd.f32 %v1861_v4, %v1674_v23  ;;  %v1676_v1 = vadd.f32 %v1665_v5, %v1500_v57 }
 0x205   : > { %v3375_v6 = vpop.f32.mrf.mxu1  ;;  %v3351_v7 = vpop.f32.mrf.mxu0 }
 0x207   : > { %v1864_v8 = vpop.f32.mrf.mxu1  ;;  %v1668_v9 = vpop.f32.mrf.mxu0 }
 0x208   : > { %v1879_v60 = vadd.f32 %v1864_v8, %v1675_v37  ;;  %v1677_v8 = vadd.f32 %v1668_v9, %v1501_v2  ;;  %v4333_v37 = vld [vmem:[%s4474_s8 + $0x4] ss:$0 sm:$0xff] }
 0x209   : > { %v3376_v10 = vpop.f32.mrf.mxu1  ;;  %v3352_v11 = vpop.f32.mrf.mxu0  ;;  %v2604_v2 = vld [vmem:[#allocation5 + $0x22] sm:$0xff] }
 0x20b   : > { %v1869_v12 = vpop.f32.mrf.mxu1 }
 0x20c   : > { %v1880_v4 = vadd.f32 %v1869_v12, %v1676_v1 }
 0x20d   : > { %v3379_v14 = vpop.f32.mrf.mxu1 }
 0x20f   : > { %v1872_v15 = vpop.f32.mrf.mxu1 }
 0x210   : > { %v1881_v14 = vadd.f32 %v1872_v15, %v1677_v8  ;;  %v4291_v15 = vld [vmem:[#allocation5 + $0x1b] sm:$0xff] }
 0x211   : > { %v3380_v16 = vpop.f32.mrf.mxu1 }
 0x213   : > { %v2029_v17 = vpop.f32.mrf.mxu0 }
 0x214   : > { %v2052_v61 = vadd.f32 %v2029_v17, %v1876_v20 }
 0x215   : > { %v3399_v19 = vpop.f32.mrf.mxu0 }
 0x217   : > { %v2032_v22 = vpop.f32.mrf.mxu0 }
 0x218   : > { %v2053_v40 = vadd.f32 %v2032_v22, %v1877_v34  ;;  %v4307_v34 = vld [vmem:[%s4474_s8 + $0x1] ss:$0 sm:$0xff] }
 0x219   : > { %v3400_v25 = vpop.f32.mrf.mxu0 }
 0x21b   : > { %v2233_v30 = vpop.f32.mrf.mxu1  ;;  %v2037_v32 = vpop.f32.mrf.mxu0 }
 0x21c   : > { %v2256_v24 = vadd.f32 %v2233_v30, %v2052_v61  ;;  %v2054_v27 = vadd.f32 %v2037_v32, %v1878_v43  ;;  %v3084_v61 = vld [vmem:[%s4474_s8] ss:$0 sm:$0xff]  ;;  %v4297_v32 = vld [vmem:[#allocation5 + $0x1c] sm:$0xff] }
 0x21d   : > { %v3427_v41 = vpop.f32.mrf.mxu1  ;;  %v3403_v42 = vpop.f32.mrf.mxu0  ;;  %v2494_v30 = vmul.f32 %v3084_v61, %v4291_v15 }
 0x21e   : > { %v2281_v49 = vadd.f32 %v3073_v39, %v2256_v24  ;;  %v4312_v41 = vld [vmem:[#allocation5 + $0x1d] sm:$0xff]  ;;  %v4317_v42 = vld [vmem:[%s4474_s8 + $0x2] ss:$0 sm:$0xff] }
 0x21f   : > { %v2236_v44 = vpop.f32.mrf.mxu1  ;;  %v2040_v45 = vpop.f32.mrf.mxu0  ;;  %v2498_v24 = vadd.f32 %v4302_v33, %v2494_v30 }
 0x220   : > { %v2257_v31 = vadd.f32 %v2236_v44, %v2053_v40  ;;  %v2287_v48 = vmax.f32 %v2281_v49, 0.0  ;;  %v2055_v50 = vadd.f32 %v2040_v45, %v1879_v60  ;;  %v2528_v40 = vmul.f32 %v4317_v42, %v4312_v41  ;;  %v2536_v44 = vld [vmem:[#allocation5 + $0x1e] sm:$0xff]  ;;  %v4324_v45 = vld [vmem:[%s4474_s8 + $0x3] ss:$0 sm:$0xff] }
 0x221   : > { %v3428_v53 = vpop.f32.mrf.mxu1  ;;  %v3404_v55 = vpop.f32.mrf.mxu0  ;;  %v2545_v49 = vmul.f32 %v4324_v45, %v2536_v44 }
 0x222   : > { %v2282_v46 = vadd.f32 %v3073_v39, %v2257_v31  ;;  %v2553_v31 = vld [vmem:[#allocation5 + $0x1f] sm:$0xff] }
 0x223   : > { %v2241_v58 = vpop.f32.mrf.mxu1  ;;  %v2045_v59 = vpop.f32.mrf.mxu0  ;;  %v3074_v55 = vld [vmem:[%s4473_s7] ss:$0 sm:$0xff]  ;;  %v2562_v57 = vmul.f32 %v4333_v37, %v2553_v31 }
 0x224   : > { %v2288_v51 = vmax.f32 %v2282_v46, 0.0  ;;  %v2258_v62 = vadd.f32 %v2241_v58, %v2054_v27  ;;  %v2056_v10 = vadd.f32 %v2045_v59, %v1880_v4 }
 0x225   : > { %v3431_v63 = vpop.f32.mrf.mxu1  ;;  %v3407_v0 = vpop.f32.mrf.mxu0 }
 0x226   : > { %v2293_v28 = vpack.c.bf16 %v2288_v51, %v2287_v48  ;;  %v2283_v6 = vadd.f32 %v3073_v39, %v2258_v62  ;;  %v4344_v62 = vld [vmem:[%s4474_s8 + $0x5] ss:$0 sm:$0xff]  ;;  %v2587_v63 = vld [vmem:[#allocation5 + $0x21] sm:$0xff] }
 0x227   : > { %v2244_v3 = vpop.f32.mrf.mxu1  ;;  %v2048_v54 = vpop.f32.mrf.mxu0  ;;  %v4348_v1 = vmul.f32 %v4249_v26, %v4344_v62 }
 0x228   : > { %v2259_v7 = vadd.f32 %v2244_v3, %v2055_v50  ;;  %3454 = vmatmul.mubr.bf16.vlgmr.msra.gmra.mxu0 %v2293_v28  ;;  %v2289_v16 = vmax.f32 %v2283_v6, 0.0  ;;  %v2057_v13 = vadd.f32 %v2048_v54, %v1881_v14  ;;  %v4354_v28 = vld [vmem:[%s4474_s8 + $0x6] ss:$0 sm:$0xff] }
 0x229   : > { %v3432_v47 = vpop.f32.mrf.mxu1  ;;  %v3408_v36 = vpop.f32.mrf.mxu0  ;;  %3457 = vmatprep.mubr.msk.bf16.mxu0 %vm4543_vm7, %v4249_v26  ;;  %v2596_v54 = vmul.f32 %v4354_v28, %v2587_v63 }
 0x22a   : > { %v2284_v11 = vadd.f32 %v3073_v39, %v2259_v7  ;;  %v4361_v36 = vld [vmem:[%s4474_s8 + $0x7] ss:$0 sm:$0xff] }
 0x22b   : > { %v2249_v5 = vpop.f32.mrf.mxu1 }
 0x22c   : > { %v2290_v17 = vmax.f32 %v2284_v11, 0.0  ;;  %v2260_v18 = vadd.f32 %v2249_v5, %v2056_v10  ;;  %v2613_v5 = vmul.f32 %v4361_v36, %v2604_v2 }
 0x22d   : > { %v3435_v19 = vpop.f32.mrf.mxu1 }
 0x22e   : > { %v2294_v52 = vpack.c.bf16 %v2290_v17, %v2289_v16  ;;  %v2285_v12 = vadd.f32 %v3073_v39, %v2260_v18  ;;  %v2618_v17 = vld [vmem:[#allocation5 + $0x23] sm:$0xff] }
 0x22f   : > { %v2252_v56 = vpop.f32.mrf.mxu1 }
 0x230   : > { %v2261_v22 = vadd.f32 %v2252_v56, %v2057_v13  ;;  %3458 = vmatmul.mubr.bf16.gmra.mxu0 %v2294_v52  ;;  %v2291_v9 = vmax.f32 %v2285_v12, 0.0  ;;  %v4372_v12 = vld [vmem:[%s4474_s8 + $0x8] ss:$0 sm:$0xff] }
 0x231   : > { %v3436_v21 = vpop.f32.mrf.mxu1  ;;  %3461 = vmatprep.mubr.msk.bf16.mxu0 %vm4543_vm7, %v4249_v26 }
 0x232   : > { %v2286_v20 = vadd.f32 %v3073_v39, %v2261_v22  ;;  %v2511_v39 = vmul.f32 %v4307_v34, %v4297_v32 }
 0x234   : > { %v2292_v25 = vmax.f32 %v2286_v20, 0.0  ;;  %v2515_v23 = vadd.f32 %v2511_v39, %v2498_v24  ;;  %v2627_v39 = vmul.f32 %v4372_v12, %v2618_v17 }
 0x236   : > { %v2295_v29 = vpack.c.bf16 %v2292_v25, %v2291_v9  ;;  %v2532_v43 = vadd.f32 %v2528_v40, %v2515_v23 }
 0x238   : > { %3462 = vmatmul.mubr.bf16.gmra.mxu0 %v2295_v29  ;;  %v2549_v46 = vadd.f32 %v2545_v49, %v2532_v43 }
 0x23a   : > { %v2566_v48 = vadd.f32 %v2562_v57, %v2549_v46  ;;  %v4394_v46 = vld [vmem:[%s4474_s8 + $0x9] ss:$0 sm:$0xff] }
 0x23c   : > { %v2583_v3 = vadd.f32 %v4348_v1, %v2566_v48 }
 0x23e   : > { %v2600_v11 = vadd.f32 %v2596_v54, %v2583_v3 }
 0x240   : > { %v2617_v24 = vadd.f32 %v2613_v5, %v2600_v11 }
 0x2e8   : > { %v2401_v35 = vpop.f32.mrf.mxu0 }
 0x2e9   : > { %v2632_v35 = vld [vmem:[#allocation5 + $0x24] sm:$0xff] }
 0x2ea   : > { %v3455_v53 = vpop.f32.mrf.mxu0 }
 0x2ec   : > { %v2404_v27 = vpop.f32.mrf.mxu0 }
 0x2ed   : > { %v4336_v58 = vadd.f32 %v3074_v55, %v2404_v27 }
 0x2ee   : > { %v3456_v59 = vpop.f32.mrf.mxu0 }
 0x2ef   : > { %2469 = vst [vmem:[#allocation5 + $0x8] sm:$0xff] %v4336_v58  ;;  %v2576_v54 = vmul.f32 %v4344_v62, %v4336_v58 }
 0x2f0   : > { %v2409_v60 = vpop.f32.mrf.mxu0 }
 0x2f1   : > { %v4339_v51 = vadd.f32 %v3074_v55, %v2409_v60 }
 0x2f2   : > { %v3459_v0 = vpop.f32.mrf.mxu0 }
 0x2f3   : > { %2470 = vst [vmem:[#allocation5 + $0x10] sm:$0xff] %v4339_v51 }
 0x2f4   : > { %v2412_v50 = vpop.f32.mrf.mxu0 }
 0x2f5   : > { %v2631_v50 = vadd.f32 %v2627_v39, %v2617_v24 }
 0x2f6   : > { %v3460_v4 = vpop.f32.mrf.mxu0  ;;  %v2482_v6 = vld [vmem:[#allocation5 + $0x3] sm:$0xff] }
 0x2f7   : > { %v2499_v7 = vld [vmem:[#allocation5 + $0x4] sm:$0xff]  ;;  %v2491_v47 = vmul.f32 %v3084_v61, %v2482_v6 }
 0x2f8   : > { %v2417_v8 = vpop.f32.mrf.mxu0  ;;  %v2516_v10 = vld [vmem:[#allocation5 + $0x5] sm:$0xff]  ;;  %v2508_v16 = vmul.f32 %v4307_v34, %v2499_v7 }
 0x2f9   : > { %v2495_v14 = vadd.f32 %v4302_v33, %v2491_v47  ;;  %v2533_v13 = vld [vmem:[#allocation5 + $0x6] sm:$0xff]  ;;  %v2525_v56 = vmul.f32 %v4317_v42, %v2516_v10 }
 0x2fa   : > { %v3463_v18 = vpop.f32.mrf.mxu0  ;;  %v4366_v19 = vld [vmem:[#allocation5 + $0xb] sm:$0xff]  ;;  %v4374_v22 = vld [vmem:[#allocation5 + $0x13] sm:$0xff]  ;;  %v2542_v40 = vmul.f32 %v4324_v45, %v2533_v13 }
 0x2fb   : > { %v2512_v52 = vadd.f32 %v2508_v16, %v2495_v14  ;;  %v4376_v20 = vld [vmem:[#allocation5 + $0xc] sm:$0xff]  ;;  %v2492_v25 = vmul.f32 %v3084_v61, %v4366_v19  ;;  %v2493_v29 = vmul.f32 %v3084_v61, %v4374_v22  ;;  %v4380_v30 = vld [vmem:[#allocation5 + $0x14] sm:$0xff] }
 0x2fc   : > { %v2420_v21 = vpop.f32.mrf.mxu0  ;;  %v2550_v9 = vld [vmem:[#allocation5 + $0x7] sm:$0xff]  ;;  %v4384_v44 = vld [vmem:[#allocation5 + $0x15] sm:$0xff]  ;;  %v2510_v53 = vmul.f32 %v4307_v34, %v4380_v30  ;;  %v2509_v59 = vmul.f32 %v4307_v34, %v4376_v20 }
 0x2fd   : > { %v2529_v23 = vadd.f32 %v2525_v56, %v2512_v52  ;;  %v2517_v49 = vld [vmem:[#allocation5 + $0xd] sm:$0xff]  ;;  %v2497_v31 = vadd.f32 %v4302_v33, %v2493_v29  ;;  %v2496_v61 = vadd.f32 %v4302_v33, %v2492_v25  ;;  %v2559_v27 = vmul.f32 %v4333_v37, %v2550_v9  ;;  %v2535_v57 = vld [vmem:[#allocation5 + $0x16] sm:$0xff]  ;;  %v2646_v7 = vld [vmem:[#allocation5 + $0x25] sm:$0xff] }
 0x2fe   : > { %v3464_v43 = vpop.f32.mrf.mxu0  ;;  %v2584_v60 = vld [vmem:[#allocation5 + $0x9] sm:$0xff]  ;;  %v2527_v63 = vmul.f32 %v4317_v42, %v4384_v44  ;;  %v2641_v33 = vmul.f32 %v4394_v46, %v2632_v35  ;;  %v2552_v2 = vld [vmem:[#allocation5 + $0x17] sm:$0xff]  ;;  %v2526_v6 = vmul.f32 %v4317_v42, %v2517_v49  ;;  %v2544_v8 = vmul.f32 %v4324_v45, %v2535_v57 }
 0x2ff   : > { %v2546_v55 = vadd.f32 %v2542_v40, %v2529_v23  ;;  %v2514_v48 = vadd.f32 %v2510_v53, %v2497_v31  ;;  %v2534_v0 = vld [vmem:[#allocation5 + $0xe] sm:$0xff]  ;;  %v2513_v4 = vadd.f32 %v2509_v59, %v2496_v61  ;;  %v2593_v5 = vmul.f32 %v4354_v28, %v2584_v60  ;;  %v2586_v16 = vld [vmem:[#allocation5 + $0x19] sm:$0xff] }
 0x300   : > { %v2601_v47 = vld [vmem:[#allocation5 + $0xa] sm:$0xff]  ;;  %v2543_v18 = vmul.f32 %v4324_v45, %v2534_v0  ;;  %v2561_v42 = vmul.f32 %v4333_v37, %v2552_v2  ;;  %v2645_v52 = vadd.f32 %v2641_v33, %v2631_v50  ;;  %v2603_v25 = vld [vmem:[#allocation5 + $0x1a] sm:$0xff]  ;;  %v2595_v23 = vmul.f32 %v4354_v28, %v2586_v16 }
 0x301   : > { %v2563_v3 = vadd.f32 %v2559_v27, %v2546_v55  ;;  %v2531_v34 = vadd.f32 %v2527_v63, %v2514_v48  ;;  %v2551_v10 = vld [vmem:[#allocation5 + $0xf] sm:$0xff]  ;;  %v3094_v14 = vld [vmem:[%s4474_s8 + $0xa] ss:$0 sm:$0xff]  ;;  %v2530_v17 = vadd.f32 %v2526_v6, %v2513_v4  ;;  %v2610_v9 = vmul.f32 %v4361_v36, %v2601_v47 }
 0x302   : > { %v2655_v56 = vmul.f32 %v3094_v14, %v2646_v7  ;;  %v2560_v24 = vmul.f32 %v4333_v37, %v2551_v10  ;;  %v2585_v40 = vld [vmem:[#allocation5 + $0x11] sm:$0xff]  ;;  %v2624_v45 = vmul.f32 %v4372_v12, %v4366_v19  ;;  %v2577_v31 = vmul.f32 %v4344_v62, %v4339_v51 }
 0x303   : > { %v2580_v11 = vadd.f32 %v2576_v54, %v2563_v3  ;;  %v2548_v13 = vadd.f32 %v2544_v8, %v2531_v34  ;;  %v2547_v29 = vadd.f32 %v2543_v18, %v2530_v17  ;;  %v2612_v61 = vmul.f32 %v4361_v36, %v2603_v25  ;;  %v2602_v55 = vld [vmem:[#allocation5 + $0x12] sm:$0xff] }
 0x304   : > { %v2659_v27 = vadd.f32 %v2655_v56, %v2645_v52  ;;  %v2638_v37 = vmul.f32 %v4394_v46, %v4376_v20  ;;  %v2594_v60 = vmul.f32 %v4354_v28, %v2585_v40  ;;  %v2626_v19 = vmul.f32 %v4372_v12, %v4291_v15 }
 0x305   : > { %v2597_v21 = vadd.f32 %v2593_v5, %v2580_v11  ;;  %v2565_v39 = vadd.f32 %v2561_v42, %v2548_v13  ;;  %v2564_v43 = vadd.f32 %v2560_v24, %v2547_v29  ;;  %v2652_v0 = vmul.f32 %v3094_v14, %v2517_v49 }
 0x306   : > { %v2640_v33 = vmul.f32 %v4394_v46, %v4297_v32  ;;  %v3098_v3 = vmul.f32 -1.442695, %v2659_v27  ;;  %v2625_v20 = vmul.f32 %v4372_v12, %v4374_v22  ;;  %v2654_v4 = vmul.f32 %v3094_v14, %v4312_v41 }
 0x307   : > { %v2614_v35 = vadd.f32 %v2610_v9, %v2597_v21  ;;  %v2582_v53 = vadd.f32 %v4348_v1, %v2565_v39  ;;  %v2581_v59 = vadd.f32 %v2577_v31, %v2564_v43  ;;  %v2611_v1 = vmul.f32 %v4361_v36, %v2602_v55 }
 0x308   : > { %v2639_v49 = vmul.f32 %v4394_v46, %v4380_v30  ;;  %3574 = vpow2.f32 %v3098_v3  ;;  %v2653_v36 = vmul.f32 %v3094_v14, %v4384_v44 }
 0x309   : > { %v2628_v57 = vadd.f32 %v2624_v45, %v2614_v35  ;;  %v2599_v48 = vadd.f32 %v2595_v23, %v2582_v53  ;;  %v2598_v62 = vadd.f32 %v2594_v60, %v2581_v59 }
 0x30b   : > { %v2642_v63 = vadd.f32 %v2638_v37, %v2628_v57  ;;  %v2616_v50 = vadd.f32 %v2612_v61, %v2599_v48  ;;  %v2615_v2 = vadd.f32 %v2611_v1, %v2598_v62 }
 0x30d   : > { %v2656_v54 = vadd.f32 %v2652_v0, %v2642_v63  ;;  %v2630_v28 = vadd.f32 %v2626_v19, %v2616_v50  ;;  %v2629_v15 = vadd.f32 %v2625_v20, %v2615_v2  ;;  %v3100_v20 = vld [vmem:[%s4477_s11] ss:$0 sm:$0xff] }
 0x30f   : > { %v3095_v6 = vmul.f32 -1.442695, %v2656_v54  ;;  %v2644_v7 = vadd.f32 %v2640_v33, %v2630_v28  ;;  %v2643_v32 = vadd.f32 %v2639_v49, %v2629_v15  ;;  %v3099_v54 = vld [vmem:[%s4476_s10] ss:$0 sm:$0xff] }
 0x311   : > { %3576 = vpow2.f32 %v3095_v6  ;;  %v2658_v47 = vadd.f32 %v2654_v4, %v2644_v7  ;;  %v2657_v34 = vadd.f32 %v2653_v36, %v2643_v32 }
 0x313   : > { %v3097_v8 = vmul.f32 -1.442695, %v2658_v47  ;;  %v3096_v10 = vmul.f32 -1.442695, %v2657_v34 }
 0x315   : > { %3578 = vpow2.f32 %v3097_v8  ;;  %v3575_v12 = vpop.eup %3574 }
 0x316   : > { %3580 = vpow2.f32 %v3096_v10  ;;  %v2675_v11 = vadd.f32 1.0, %v3575_v12 }
 0x31e   : > { %v3577_v22 = vpop.eup %3576 }
 0x31f   : > { %v2672_v41 = vadd.f32 1.0, %v3577_v22 }
 0x321   : > { %3582 = vrcp.f32 %v2672_v41 }
 0x322   : > { %v3579_v5 = vpop.eup %3578  ;;  %3584 = vrcp.f32 %v2675_v11 }
 0x323   : > { %v3581_v16 = vpop.eup %3580  ;;  %v2674_v30 = vadd.f32 1.0, %v3579_v5 }
 0x324   : > { %v2673_v46 = vadd.f32 1.0, %v3581_v16 }
 0x325   : > { %3586 = vrcp.f32 %v2674_v30 }
 0x326   : > { %3588 = vrcp.f32 %v2673_v46 }
 0x32e   : > { %v3583_v44 = vpop.eup %3582 }
 0x32f   : > { %v2684_v14 = vmul.f32 %v3583_v44, %v4336_v58  ;;  %v3585_v17 = vpop.eup %3584 }
 0x330   : > { %v2687_v56 = vmul.f32 %v4249_v26, %v3585_v17 }
 0x331   : > { %2688 = vadd.xlane.f32.xlu0 %v2684_v14 }
 0x332   : > { %v3587_v18 = vpop.eup %3586 }
 0x333   : > { %v3589_v13 = vpop.eup %3588  ;;  %v2686_v42 = vmul.f32 %v4249_v26, %v3587_v18 }
 0x334   : > { %v2685_v52 = vmul.f32 %v3589_v13, %v4339_v51 }
 0x335   : > { %2692 = vadd.xlane.f32.xlu1 %v2686_v42 }
 0x336   : > { %2690 = vadd.xlane.f32.xlu0 %v2685_v52 }
 0x339   : > { %2694 = vadd.xlane.f32.xlu1 %v2687_v56 }
 0x3ba   : > { %v2689_v21 = vpop.xlane.xlu0 %2688 }
 0x3bb   : > { %v2696_v9 = vmul.f32 0.010416667, %v2689_v21 }
 0x3bd   : > { %v2701_v25 = vsub.f32 %v2684_v14, %v2696_v9 }
 0x3be   : > { %v2693_v29 = vpop.xlane.xlu1 %2692 }
 0x3bf   : > { %v2707_v58 = vsel %vm2700_vm11, %v2701_v25, 0.0  ;;  %v2698_v24 = vmul.f32 0.010416667, %v2693_v29  ;;  %v2691_v39 = vpop.xlane.xlu0 %2690 }
 0x3c0   : > { %v2711_v23 = vmul.f32 %v2707_v58, %v2707_v58  ;;  %v2697_v40 = vmul.f32 0.010416667, %v2691_v39 }
 0x3c1   : > { %v2703_v35 = vsub.f32 %v2686_v42, %v2698_v24 }
 0x3c2   : > { %2715 = vadd.xlane.f32.xlu0 %v2711_v23  ;;  %v2702_v51 = vsub.f32 %v2685_v52, %v2697_v40  ;;  %v2695_v45 = vpop.xlane.xlu1 %2694 }
 0x3c3   : > { %v2699_v26 = vmul.f32 0.010416667, %v2695_v45  ;;  %v2709_v43 = vsel %vm2700_vm11, %v2703_v35, 0.0 }
 0x3c4   : > { %v2713_v31 = vmul.f32 %v2709_v43, %v2709_v43  ;;  %v2708_v53 = vsel %vm2700_vm11, %v2702_v51, 0.0 }
 0x3c5   : > { %v2704_v61 = vsub.f32 %v2687_v56, %v2699_v26  ;;  %v2712_v55 = vmul.f32 %v2708_v53, %v2708_v53 }
 0x3c6   : > { %2719 = vadd.xlane.f32.xlu0 %v2713_v31 }
 0x3c7   : > { %2717 = vadd.xlane.f32.xlu1 %v2712_v55  ;;  %v2710_v27 = vsel %vm2700_vm11, %v2704_v61, 0.0 }
 0x3c8   : > { %v2714_v57 = vmul.f32 %v2710_v27, %v2710_v27 }
 0x3cb   : > { %2721 = vadd.xlane.f32.xlu1 %v2714_v57 }
 0x44b   : > { %v2716_v37 = vpop.xlane.xlu0 %2715 }
 0x44c   : > { %v2723_v59 = vmul.f32 0.010416667, %v2716_v37 }
 0x44e   : > { %v2727_v60 = vadd.f32 1e-06, %v2723_v59 }
 0x44f   : > { %v2720_v48 = vpop.xlane.xlu0 %2719 }
 0x450   : > { %3590 = vrsqrt.f32 %v2727_v60  ;;  %v2718_v19 = vpop.xlane.xlu1 %2717  ;;  %v2725_v63 = vmul.f32 0.010416667, %v2720_v48 }
 0x451   : > { %v2724_v0 = vmul.f32 0.010416667, %v2718_v19 }
 0x452   : > { %v2729_v62 = vadd.f32 1e-06, %v2725_v63 }
 0x453   : > { %v2728_v1 = vadd.f32 1e-06, %v2724_v0 }
 0x454   : > { %3592 = vrsqrt.f32 %v2729_v62  ;;  %v2722_v50 = vpop.xlane.xlu1 %2721 }
 0x455   : > { %3594 = vrsqrt.f32 %v2728_v1  ;;  %v2726_v33 = vmul.f32 0.010416667, %v2722_v50 }
 0x457   : > { %v2730_v3 = vadd.f32 1e-06, %v2726_v33 }
 0x459   : > { %3596 = vrsqrt.f32 %v2730_v3 }
 0x45d   : > { %v3591_v38 = vpop.eup %3590 }
 0x45e   : > { %v2735_v2 = vmul.f32 %v3591_v38, %v2701_v25 }
 0x460   : > { %v2746_v28 = vmul.f32 %v3099_v54, %v2735_v2 }
 0x461   : > { %v3593_v4 = vpop.eup %3592 }
 0x462   : > { %v2757_v6 = vadd.f32 %v3100_v20, %v2746_v28  ;;  %v3595_v15 = vpop.eup %3594  ;;  %v2737_v49 = vmul.f32 %v3593_v4, %v2703_v35 }
 0x463   : > { %v2736_v7 = vmul.f32 %v3595_v15, %v2702_v51 }
 0x464   : > { %2761 = vst [vmem:[%s494_s18] sm:$0xff] %v2757_v6  ;;  %v2748_v36 = vmul.f32 %v3099_v54, %v2737_v49 }
 0x465   : > { %v2747_v32 = vmul.f32 %v3099_v54, %v2736_v7 }
 0x466   : > { %v3597_v47 = vpop.eup %3596  ;;  %v2759_v34 = vadd.f32 %v3100_v20, %v2748_v36 }
 0x467   : > { %v2758_v8 = vadd.f32 %v3100_v20, %v2747_v32  ;;  %v2738_v10 = vmul.f32 %v3597_v47, %v2704_v61 }
 0x468   : > { %2763 = vst [vmem:[%s494_s18 + $0x10] sm:$0xff] %v2759_v34 }
 0x469   : > { %2762 = vst [vmem:[%s494_s18 + $0x8] sm:$0xff] %v2758_v8  ;;  %v2749_v12 = vmul.f32 %v3099_v54, %v2738_v10 }
 0x46b   : > { %v2760_v22 = vadd.f32 %v3100_v20, %v2749_v12 }
 0x46d   : > { %2764 = vst [vmem:[%s494_s18 + $0x18] sm:$0xff] %v2760_v22 }
 0x46e PF: > { %s22_s23 = sadd.s32 1, %s3621_s23   ;;  %s4544_s21 = smov %s3617_s22 }
 0x46f   : > { %p19_p5 = scmp.ge.s32.totalorder %s22_s23, 4   ;;  %s4545_s22 = smov %s4547_s24 }
 0x471   :  { %21 = sbr.rel (!%p19_p5) target bundleno = 2 (0x2), region = 109 }

</bundles_post_ra>
